<compile_context>
chip_gen: v7x
topology: tpu7x:2x2x1
jax: 0.10.0
libtpu: 0.0.40
codegen_flags: <defaults>
</compile_context>

<pallas_src>
import functools

import jax
import jax.numpy as jnp
from jax import lax
from jax.experimental import pallas as pl
from jax.experimental.pallas import tpu as pltpu


def _conv_out(s, k=3, st=2):
    return (s - k) // st + 1


# ----------------------------------------------------------------------------
# In-kernel conv layer: Conv2d(k=3, stride=2, pad=0) + bias + ReLU, VMEM-only.
# ----------------------------------------------------------------------------
def _conv_layer(read_row, in_w, w_ref, b_ref, out_ref):
    """read_row(r) -> input row r as (in_w, Cin) f32.  out_ref: (Ho, Wo, Cout)."""
    ho_n, wo_n, c_out = out_ref.shape
    c_in = w_ref.shape[1]

    # Constant 0/1 selection matrices: sel[kx][wo, w] = 1 iff w == 2*wo + kx.
    row_id = lax.broadcasted_iota(jnp.int32, (wo_n, in_w), 0)
    col_id = lax.broadcasted_iota(jnp.int32, (wo_n, in_w), 1)
    sels = [(col_id == 2 * row_id + kx).astype(jnp.float32) for kx in range(3)]

    wk = [w_ref[k] for k in range(9)]   # 9 x (Cin, Cout), hoisted out of the loop
    bias = b_ref[...]                   # (1, Cout)

    def body(ho, carry):
        acc = jnp.zeros((wo_n, c_out), jnp.float32)
        for ky in range(3):
            slab = read_row(2 * ho + ky)                     # (in_w, Cin)
            for kx in range(3):
                k_idx = ky * 3 + kx
                if c_in == 1:
                    # Outer product: keep it on the VPU instead of a K=1 matmul.
                    proj = slab * wk[k_idx]                  # (in_w, Cout)
                else:
                    proj = jnp.dot(slab, wk[k_idx],
                                   preferred_element_type=jnp.float32)
                acc = acc + jnp.dot(sels[kx], proj,
                                    preferred_element_type=jnp.float32)  # (Wo, Cout)
        out_ref[ho] = jnp.maximum(acc + bias, 0.0)           # bias+ReLU epilogue
        return carry

    lax.fori_loop(0, ho_n, body, 0)


# ----------------------------------------------------------------------------
# Fused encoder kernel: 4 convs + FC, one grid step per batch sample.
# ----------------------------------------------------------------------------
def _encoder_kernel(x_ref, w1_ref, b1_ref, w2_ref, b2_ref, w3_ref, b3_ref,
                    w4_ref, b4_ref, fc_ref, o_ref, a1, a2, a3, a4):
    in_w = x_ref.shape[2]
    # Layer 1 reads the (1, H, W, C) input block; layers 2-4 read VMEM scratch.
    _conv_layer(lambda r: x_ref[0, r], in_w, w1_ref, b1_ref, a1)
    _conv_layer(lambda r: a1[r], a1.shape[1], w2_ref, b2_ref, a2)
    _conv_layer(lambda r: a2[r], a2.shape[1], w3_ref, b3_ref, a3)
    _conv_layer(lambda r: a3[r], a3.shape[1], w4_ref, b4_ref, a4)

    # Fully connected: out[z] = sum_{h,w,c} a4[h, w, c] * fc[(h, w), c, z].
    h4, w4, _ = a4.shape
    zp = o_ref.shape[2]
    out = jnp.zeros((1, zp), jnp.float32)
    for p in range(h4 * w4):                 # static unroll; after_conv**2 is small
        hh, ww = p // w4, p % w4
        vec = a4[hh, pl.ds(ww, 1), :]        # (1, C4)
        out = out + jnp.dot(vec, fc_ref[p], preferred_element_type=jnp.float32)
    o_ref[0] = out                           # lane-dense (1, 128k) store


def _const_spec(arr):
    nd = arr.ndim
    return pl.BlockSpec(arr.shape, lambda n, _nd=nd: (0,) * _nd)


@functools.partial(jax.jit, static_argnames=("z_dim",))
def encoder_forward(x_nchw, kparams, *, z_dim):
    """Fused Pallas forward pass.  x_nchw: (N, chan, H, W) float32 (PyTorch layout)."""
    n, chan, h, w = x_nchw.shape
    x = jnp.transpose(x_nchw, (0, 2, 3, 1))                  # NCHW -> NHWC (C on lanes)

    (w1, b1), (w2, b2), (w3, b3), (w4, b4) = kparams["convs"]
    fck = kparams["fc"]
    zp = fck.shape[-1]

    # Per-layer spatial sizes / channel counts.
    hs, ws = [h], [w]
    for _ in range(4):
        hs.append(_conv_out(hs[-1]))
        ws.append(_conv_out(ws[-1]))
    couts = [w1.shape[2], w2.shape[2], w3.shape[2], w4.shape[2]]
    scratch = [pltpu.VMEM((hs[i + 1], ws[i + 1], couts[i]), jnp.float32)
               for i in range(4)]

    out = pl.pallas_call(
        _encoder_kernel,
        grid=(n,),
        in_specs=[
            pl.BlockSpec((1, h, w, chan), lambda i: (i, 0, 0, 0)),
            _const_spec(w1), _const_spec(b1),
            _const_spec(w2), _const_spec(b2),
            _const_spec(w3), _const_spec(b3),
            _const_spec(w4), _const_spec(b4),
            _const_spec(fck),
        ],
        out_specs=pl.BlockSpec((1, 1, zp), lambda i: (i, 0, 0)),
        out_shape=jax.ShapeDtypeStruct((n, 1, zp), jnp.float32),
        scratch_shapes=scratch,
        compiler_params=pltpu.CompilerParams(dimension_semantics=("parallel",)),
    )(x, w1, b1, w2, b2, w3, b3, w4, b4, fck)

    return out[:, 0, :z_dim]


# ----------------------------------------------------------------------------
# Parameters: PyTorch-layout init + one-time conversion to kernel layout.
# ----------------------------------------------------------------------------
def init_params(key, z_dim, chan, w, d):
    """Parameters in PyTorch layout: Conv2d weight (O, I, 3, 3), Linear (out, in)."""
    dims = [chan, d, d * 2, d * 4, d * 4]
    convs = []
    for i in range(4):
        key, k1, k2 = jax.random.split(key, 3)
        fan_in = dims[i] * 9
        wt = jax.random.normal(k1, (dims[i + 1], dims[i], 3, 3), jnp.float32)
        wt = wt * (1.0 / jnp.sqrt(jnp.float32(fan_in)))
        b = jax.random.normal(k2, (dims[i + 1],), jnp.float32) * 0.01
        convs.append((wt, b))
    conv_size = w
    for _ in range(4):
        conv_size = _conv_out(conv_size)
    size = d * 4 * conv_size ** 2
    key, kf = jax.random.split(key)
    w_fc = jax.random.normal(kf, (z_dim, size), jnp.float32)
    w_fc = w_fc * (1.0 / jnp.sqrt(jnp.float32(size)))
    return {"convs": convs, "fc": w_fc}, conv_size, size


def prepare_kernel_params(params, after_conv, z_dim):
    """One-time conversion into kernel-ready layout (done outside the forward)."""
    convs = []
    for (wt, b) in params["convs"]:
        c_out, c_in, _, _ = wt.shape
        wk = jnp.transpose(wt, (2, 3, 1, 0)).reshape(9, c_in, c_out)  # (ky*3+kx, Cin, Cout)
        convs.append((wk, b.reshape(1, c_out)))
    c4 = params["convs"][-1][0].shape[0]
    p = after_conv * after_conv
    zp = ((z_dim + 127) // 128) * 128                  # lane-dense output width
    # PyTorch flattens NCHW: fc[z, c*H*W + h*W + w]  ->  (h*W + w, c, z), zero-padded in z.
    fck = params["fc"].reshape(z_dim, c4, after_conv, after_conv)
    fck = jnp.transpose(fck, (2, 3, 1, 0)).reshape(p, c4, z_dim)
    fck = jnp.pad(fck, ((0, 0), (0, 0), (0, zp - z_dim)))
    return {"convs": convs, "fc": fck}


# ----------------------------------------------------------------------------
# Pure-JAX reference for correctness checking.
# ----------------------------------------------------------------------------
def encoder_reference(x_nchw, params):
    x = x_nchw
    for (wt, b) in params["convs"]:
        x = lax.conv_general_dilated(
            x, wt, window_strides=(2, 2), padding="VALID",
            dimension_numbers=("NCHW", "OIHW", "NCHW"),
            precision=lax.Precision.HIGHEST)
        x = jnp.maximum(x + b.reshape(1, -1, 1, 1), 0.0)
    flat = x.reshape(x.shape[0], -1)                   # NCHW flatten, like PyTorch .view
    return jnp.dot(flat, params["fc"].T, precision=lax.Precision.HIGHEST)


if __name__ == "__main__":
    # Small shapes consistent with the module: four stride-2 valid 3x3 convs need
    # w >= 31 to leave a >=1 spatial extent, so use w=34 (after_conv == 1).
    batch, z_dim, chan, w, d = 2, 2, 1, 34, 8
    key = jax.random.PRNGKey(0)
    key, kx = jax.random.split(key)
    x = jax.random.normal(kx, (batch, chan, w, w), jnp.float32)   # NCHW, like PyTorch

    params, after_conv, size = init_params(key, z_dim, chan, w, d)
    assert after_conv == 1 and size == d * 4 * after_conv ** 2

    kparams = prepare_kernel_params(params, after_conv, z_dim)

    z = encoder_forward(x, kparams, z_dim=z_dim)
    jax.block_until_ready(z)
    assert z.shape == (batch, z_dim)

    z_ref = encoder_reference(x, params)
    err = float(jnp.max(jnp.abs(z - z_ref)))
    assert err < 2e-2, f"kernel/reference mismatch: max abs err {err}"

    print("KERNEL_OK")
</pallas_src>

<mosaic_0001>
module attributes {stable_mosaic.version = 11 : i64} {
  func.func @_encoder_kernel(%arg0: i32, %arg1: memref<1x34x34x1xf32, #tpu.memory_space<vmem>>, %arg2: memref<9x1x8xf32, #tpu.memory_space<vmem>>, %arg3: memref<1x8xf32, #tpu.memory_space<vmem>>, %arg4: memref<9x8x16xf32, #tpu.memory_space<vmem>>, %arg5: memref<1x16xf32, #tpu.memory_space<vmem>>, %arg6: memref<9x16x32xf32, #tpu.memory_space<vmem>>, %arg7: memref<1x32xf32, #tpu.memory_space<vmem>>, %arg8: memref<9x32x32xf32, #tpu.memory_space<vmem>>, %arg9: memref<1x32xf32, #tpu.memory_space<vmem>>, %arg10: memref<1x32x128xf32, #tpu.memory_space<vmem>>, %arg11: memref<1x1x128xf32, #tpu.memory_space<vmem>>, %arg12: memref<16x16x8xf32, #tpu.memory_space<vmem>>, %arg13: memref<7x7x16xf32, #tpu.memory_space<vmem>>, %arg14: memref<3x3x32xf32, #tpu.memory_space<vmem>>, %arg15: memref<1x1x32xf32, #tpu.memory_space<vmem>>) attributes {dimension_semantics = [#tpu.dimension_semantics<parallel>], iteration_bounds = array<i64: 2>, scalar_prefetch = 0 : i64, scratch_operands = 4 : i64, tpu.core_type = #tpu.core_type<tc>, window_params = [{transform_indices = @transform_0, window_bounds = array<i64: 1, 34, 34, 1>}, {pipeline_mode = #tpu.pipeline_mode<synchronous>, transform_indices = @transform_1, window_bounds = array<i64: 9, 1, 8>}, {pipeline_mode = #tpu.pipeline_mode<synchronous>, transform_indices = @transform_2, window_bounds = array<i64: 1, 8>}, {pipeline_mode = #tpu.pipeline_mode<synchronous>, transform_indices = @transform_3, window_bounds = array<i64: 9, 8, 16>}, {pipeline_mode = #tpu.pipeline_mode<synchronous>, transform_indices = @transform_4, window_bounds = array<i64: 1, 16>}, {pipeline_mode = #tpu.pipeline_mode<synchronous>, transform_indices = @transform_5, window_bounds = array<i64: 9, 16, 32>}, {pipeline_mode = #tpu.pipeline_mode<synchronous>, transform_indices = @transform_6, window_bounds = array<i64: 1, 32>}, {pipeline_mode = #tpu.pipeline_mode<synchronous>, transform_indices = @transform_7, window_bounds = array<i64: 9, 32, 32>}, {pipeline_mode = #tpu.pipeline_mode<synchronous>, transform_indices = @transform_8, window_bounds = array<i64: 1, 32>}, {pipeline_mode = #tpu.pipeline_mode<synchronous>, transform_indices = @transform_9, window_bounds = array<i64: 1, 32, 128>}, {transform_indices = @transform_10, window_bounds = array<i64: 1, 1, 128>}]} {
    %0 = tpu.iota {dimensions = array<i32: 0>} : vector<16x34xi32>
    %1 = tpu.iota {dimensions = array<i32: 1>} : vector<16x34xi32>
    %c2_i32 = arith.constant 2 : i32
    %2 = vector.broadcast %c2_i32 : i32 to vector<16x34xi32>
    %3 = arith.muli %2, %0 : vector<16x34xi32>
    %c0_i32 = arith.constant 0 : i32
    %4 = vector.broadcast %c0_i32 : i32 to vector<16x34xi32>
    %5 = arith.addi %3, %4 : vector<16x34xi32>
    %6 = arith.cmpi eq, %1, %5 : vector<16x34xi32>
    %7 = arith.extui %6 : vector<16x34xi1> to vector<16x34xi32>
    %8 = arith.sitofp %7 : vector<16x34xi32> to vector<16x34xf32>
    %c2_i32_0 = arith.constant 2 : i32
    %9 = vector.broadcast %c2_i32_0 : i32 to vector<16x34xi32>
    %10 = arith.muli %9, %0 : vector<16x34xi32>
    %c1_i32 = arith.constant 1 : i32
    %11 = vector.broadcast %c1_i32 : i32 to vector<16x34xi32>
    %12 = arith.addi %10, %11 : vector<16x34xi32>
    %13 = arith.cmpi eq, %1, %12 : vector<16x34xi32>
    %14 = arith.extui %13 : vector<16x34xi1> to vector<16x34xi32>
    %15 = arith.sitofp %14 : vector<16x34xi32> to vector<16x34xf32>
    %c2_i32_1 = arith.constant 2 : i32
    %16 = vector.broadcast %c2_i32_1 : i32 to vector<16x34xi32>
    %17 = arith.muli %16, %0 : vector<16x34xi32>
    %c2_i32_2 = arith.constant 2 : i32
    %18 = vector.broadcast %c2_i32_2 : i32 to vector<16x34xi32>
    %19 = arith.addi %17, %18 : vector<16x34xi32>
    %20 = arith.cmpi eq, %1, %19 : vector<16x34xi32>
    %21 = arith.extui %20 : vector<16x34xi1> to vector<16x34xi32>
    %22 = arith.sitofp %21 : vector<16x34xi32> to vector<16x34xf32>
    %c0 = arith.constant 0 : index
    %c0_3 = arith.constant 0 : index
    %c0_4 = arith.constant 0 : index
    %23 = vector.load %arg2[%c0, %c0_3, %c0_4] : memref<9x1x8xf32, #tpu.memory_space<vmem>>, vector<1x1x8xf32>
    %24 = vector.shape_cast %23 : vector<1x1x8xf32> to vector<1x8xf32>
    %c1 = arith.constant 1 : index
    %c0_5 = arith.constant 0 : index
    %c0_6 = arith.constant 0 : index
    %25 = vector.load %arg2[%c1, %c0_5, %c0_6] : memref<9x1x8xf32, #tpu.memory_space<vmem>>, vector<1x1x8xf32>
    %26 = vector.shape_cast %25 : vector<1x1x8xf32> to vector<1x8xf32>
    %c2 = arith.constant 2 : index
    %c0_7 = arith.constant 0 : index
    %c0_8 = arith.constant 0 : index
    %27 = vector.load %arg2[%c2, %c0_7, %c0_8] : memref<9x1x8xf32, #tpu.memory_space<vmem>>, vector<1x1x8xf32>
    %28 = vector.shape_cast %27 : vector<1x1x8xf32> to vector<1x8xf32>
    %c3 = arith.constant 3 : index
    %c0_9 = arith.constant 0 : index
    %c0_10 = arith.constant 0 : index
    %29 = vector.load %arg2[%c3, %c0_9, %c0_10] : memref<9x1x8xf32, #tpu.memory_space<vmem>>, vector<1x1x8xf32>
    %30 = vector.shape_cast %29 : vector<1x1x8xf32> to vector<1x8xf32>
    %c4 = arith.constant 4 : index
    %c0_11 = arith.constant 0 : index
    %c0_12 = arith.constant 0 : index
    %31 = vector.load %arg2[%c4, %c0_11, %c0_12] : memref<9x1x8xf32, #tpu.memory_space<vmem>>, vector<1x1x8xf32>
    %32 = vector.shape_cast %31 : vector<1x1x8xf32> to vector<1x8xf32>
    %c5 = arith.constant 5 : index
    %c0_13 = arith.constant 0 : index
    %c0_14 = arith.constant 0 : index
    %33 = vector.load %arg2[%c5, %c0_13, %c0_14] : memref<9x1x8xf32, #tpu.memory_space<vmem>>, vector<1x1x8xf32>
    %34 = vector.shape_cast %33 : vector<1x1x8xf32> to vector<1x8xf32>
    %c6 = arith.constant 6 : index
    %c0_15 = arith.constant 0 : index
    %c0_16 = arith.constant 0 : index
    %35 = vector.load %arg2[%c6, %c0_15, %c0_16] : memref<9x1x8xf32, #tpu.memory_space<vmem>>, vector<1x1x8xf32>
    %36 = vector.shape_cast %35 : vector<1x1x8xf32> to vector<1x8xf32>
    %c7 = arith.constant 7 : index
    %c0_17 = arith.constant 0 : index
    %c0_18 = arith.constant 0 : index
    %37 = vector.load %arg2[%c7, %c0_17, %c0_18] : memref<9x1x8xf32, #tpu.memory_space<vmem>>, vector<1x1x8xf32>
    %38 = vector.shape_cast %37 : vector<1x1x8xf32> to vector<1x8xf32>
    %c8 = arith.constant 8 : index
    %c0_19 = arith.constant 0 : index
    %c0_20 = arith.constant 0 : index
    %39 = vector.load %arg2[%c8, %c0_19, %c0_20] : memref<9x1x8xf32, #tpu.memory_space<vmem>>, vector<1x1x8xf32>
    %40 = vector.shape_cast %39 : vector<1x1x8xf32> to vector<1x8xf32>
    %c0_21 = arith.constant 0 : index
    %c0_22 = arith.constant 0 : index
    %41 = vector.load %arg3[%c0_21, %c0_22] : memref<1x8xf32, #tpu.memory_space<vmem>>, vector<1x8xf32>
    %c0_i32_23 = arith.constant 0 : i32
    %c16_i32 = arith.constant 16 : i32
    %42 = arith.addi %c0_i32_23, %c16_i32 : i32
    %c1_i32_24 = arith.constant 1 : i32
    scf.for %arg16 = %c0_i32_23 to %42 step %c1_i32_24  : i32 {
      %cst_183 = arith.constant 0.000000e+00 : f32
      %231 = vector.broadcast %cst_183 : f32 to vector<16x8xf32>
      %c2_i32_184 = arith.constant 2 : i32
      %232 = arith.muli %c2_i32_184, %arg16 : i32
      %c0_i32_185 = arith.constant 0 : i32
      %233 = arith.addi %232, %c0_i32_185 : i32
      %c0_186 = arith.constant 0 : index
      %234 = arith.index_cast %233 : i32 to index
      %c0_187 = arith.constant 0 : index
      %c0_188 = arith.constant 0 : index
      %235 = vector.load %arg1[%c0_186, %234, %c0_187, %c0_188] : memref<1x34x34x1xf32, #tpu.memory_space<vmem>>, vector<1x1x34x1xf32>
      %236 = vector.shape_cast %235 : vector<1x1x34x1xf32> to vector<34x1xf32>
      %237 = vector.broadcast %236 : vector<34x1xf32> to vector<34x8xf32>
      %238 = vector.broadcast %24 : vector<1x8xf32> to vector<34x8xf32>
      %239 = arith.mulf %237, %238 : vector<34x8xf32>
      %cst_189 = arith.constant dense<0.000000e+00> : vector<16x8xf32>
      %240 = tpu.matmul %8, %239, %cst_189 {dimension_numbers = #tpu.dot_dimension_numbers<[1], [0], [0], [1], [0, 0, 1, 1], [], []>} : vector<16x34xf32>, vector<34x8xf32>, vector<16x8xf32> -> vector<16x8xf32>
      %241 = arith.addf %231, %240 : vector<16x8xf32>
      %242 = vector.broadcast %236 : vector<34x1xf32> to vector<34x8xf32>
      %243 = vector.broadcast %26 : vector<1x8xf32> to vector<34x8xf32>
      %244 = arith.mulf %242, %243 : vector<34x8xf32>
      %cst_190 = arith.constant dense<0.000000e+00> : vector<16x8xf32>
      %245 = tpu.matmul %15, %244, %cst_190 {dimension_numbers = #tpu.dot_dimension_numbers<[1], [0], [0], [1], [0, 0, 1, 1], [], []>} : vector<16x34xf32>, vector<34x8xf32>, vector<16x8xf32> -> vector<16x8xf32>
      %246 = arith.addf %241, %245 : vector<16x8xf32>
      %247 = vector.broadcast %236 : vector<34x1xf32> to vector<34x8xf32>
      %248 = vector.broadcast %28 : vector<1x8xf32> to vector<34x8xf32>
      %249 = arith.mulf %247, %248 : vector<34x8xf32>
      %cst_191 = arith.constant dense<0.000000e+00> : vector<16x8xf32>
      %250 = tpu.matmul %22, %249, %cst_191 {dimension_numbers = #tpu.dot_dimension_numbers<[1], [0], [0], [1], [0, 0, 1, 1], [], []>} : vector<16x34xf32>, vector<34x8xf32>, vector<16x8xf32> -> vector<16x8xf32>
      %251 = arith.addf %246, %250 : vector<16x8xf32>
      %c2_i32_192 = arith.constant 2 : i32
      %252 = arith.muli %c2_i32_192, %arg16 : i32
      %c1_i32_193 = arith.constant 1 : i32
      %253 = arith.addi %252, %c1_i32_193 : i32
      %c0_194 = arith.constant 0 : index
      %254 = arith.index_cast %253 : i32 to index
      %c0_195 = arith.constant 0 : index
      %c0_196 = arith.constant 0 : index
      %255 = vector.load %arg1[%c0_194, %254, %c0_195, %c0_196] : memref<1x34x34x1xf32, #tpu.memory_space<vmem>>, vector<1x1x34x1xf32>
      %256 = vector.shape_cast %255 : vector<1x1x34x1xf32> to vector<34x1xf32>
      %257 = vector.broadcast %256 : vector<34x1xf32> to vector<34x8xf32>
      %258 = vector.broadcast %30 : vector<1x8xf32> to vector<34x8xf32>
      %259 = arith.mulf %257, %258 : vector<34x8xf32>
      %cst_197 = arith.constant dense<0.000000e+00> : vector<16x8xf32>
      %260 = tpu.matmul %8, %259, %cst_197 {dimension_numbers = #tpu.dot_dimension_numbers<[1], [0], [0], [1], [0, 0, 1, 1], [], []>} : vector<16x34xf32>, vector<34x8xf32>, vector<16x8xf32> -> vector<16x8xf32>
      %261 = arith.addf %251, %260 : vector<16x8xf32>
      %262 = vector.broadcast %256 : vector<34x1xf32> to vector<34x8xf32>
      %263 = vector.broadcast %32 : vector<1x8xf32> to vector<34x8xf32>
      %264 = arith.mulf %262, %263 : vector<34x8xf32>
      %cst_198 = arith.constant dense<0.000000e+00> : vector<16x8xf32>
      %265 = tpu.matmul %15, %264, %cst_198 {dimension_numbers = #tpu.dot_dimension_numbers<[1], [0], [0], [1], [0, 0, 1, 1], [], []>} : vector<16x34xf32>, vector<34x8xf32>, vector<16x8xf32> -> vector<16x8xf32>
      %266 = arith.addf %261, %265 : vector<16x8xf32>
      %267 = vector.broadcast %256 : vector<34x1xf32> to vector<34x8xf32>
      %268 = vector.broadcast %34 : vector<1x8xf32> to vector<34x8xf32>
      %269 = arith.mulf %267, %268 : vector<34x8xf32>
      %cst_199 = arith.constant dense<0.000000e+00> : vector<16x8xf32>
      %270 = tpu.matmul %22, %269, %cst_199 {dimension_numbers = #tpu.dot_dimension_numbers<[1], [0], [0], [1], [0, 0, 1, 1], [], []>} : vector<16x34xf32>, vector<34x8xf32>, vector<16x8xf32> -> vector<16x8xf32>
      %271 = arith.addf %266, %270 : vector<16x8xf32>
      %c2_i32_200 = arith.constant 2 : i32
      %272 = arith.muli %c2_i32_200, %arg16 : i32
      %c2_i32_201 = arith.constant 2 : i32
      %273 = arith.addi %272, %c2_i32_201 : i32
      %c0_202 = arith.constant 0 : index
      %274 = arith.index_cast %273 : i32 to index
      %c0_203 = arith.constant 0 : index
      %c0_204 = arith.constant 0 : index
      %275 = vector.load %arg1[%c0_202, %274, %c0_203, %c0_204] : memref<1x34x34x1xf32, #tpu.memory_space<vmem>>, vector<1x1x34x1xf32>
      %276 = vector.shape_cast %275 : vector<1x1x34x1xf32> to vector<34x1xf32>
      %277 = vector.broadcast %276 : vector<34x1xf32> to vector<34x8xf32>
      %278 = vector.broadcast %36 : vector<1x8xf32> to vector<34x8xf32>
      %279 = arith.mulf %277, %278 : vector<34x8xf32>
      %cst_205 = arith.constant dense<0.000000e+00> : vector<16x8xf32>
      %280 = tpu.matmul %8, %279, %cst_205 {dimension_numbers = #tpu.dot_dimension_numbers<[1], [0], [0], [1], [0, 0, 1, 1], [], []>} : vector<16x34xf32>, vector<34x8xf32>, vector<16x8xf32> -> vector<16x8xf32>
      %281 = arith.addf %271, %280 : vector<16x8xf32>
      %282 = vector.broadcast %276 : vector<34x1xf32> to vector<34x8xf32>
      %283 = vector.broadcast %38 : vector<1x8xf32> to vector<34x8xf32>
      %284 = arith.mulf %282, %283 : vector<34x8xf32>
      %cst_206 = arith.constant dense<0.000000e+00> : vector<16x8xf32>
      %285 = tpu.matmul %15, %284, %cst_206 {dimension_numbers = #tpu.dot_dimension_numbers<[1], [0], [0], [1], [0, 0, 1, 1], [], []>} : vector<16x34xf32>, vector<34x8xf32>, vector<16x8xf32> -> vector<16x8xf32>
      %286 = arith.addf %281, %285 : vector<16x8xf32>
      %287 = vector.broadcast %276 : vector<34x1xf32> to vector<34x8xf32>
      %288 = vector.broadcast %40 : vector<1x8xf32> to vector<34x8xf32>
      %289 = arith.mulf %287, %288 : vector<34x8xf32>
      %cst_207 = arith.constant dense<0.000000e+00> : vector<16x8xf32>
      %290 = tpu.matmul %22, %289, %cst_207 {dimension_numbers = #tpu.dot_dimension_numbers<[1], [0], [0], [1], [0, 0, 1, 1], [], []>} : vector<16x34xf32>, vector<34x8xf32>, vector<16x8xf32> -> vector<16x8xf32>
      %291 = arith.addf %286, %290 : vector<16x8xf32>
      %292 = vector.broadcast %41 : vector<1x8xf32> to vector<16x8xf32>
      %293 = arith.addf %291, %292 : vector<16x8xf32>
      %cst_208 = arith.constant 0.000000e+00 : f32
      %294 = vector.broadcast %cst_208 : f32 to vector<16x8xf32>
      %295 = arith.maximumf %293, %294 : vector<16x8xf32>
      %296 = arith.index_cast %arg16 : i32 to index
      %c0_209 = arith.constant 0 : index
      %c0_210 = arith.constant 0 : index
      %297 = vector.load %arg12[%296, %c0_209, %c0_210] : memref<16x16x8xf32, #tpu.memory_space<vmem>>, vector<1x16x8xf32>
      %298 = vector.shape_cast %297 : vector<1x16x8xf32> to vector<16x8xf32>
      %299 = vector.shape_cast %295 : vector<16x8xf32> to vector<1x16x8xf32>
      tpu.vector_store %arg12[%296, %c0_209, %c0_210], %299 {strides = array<i32>} : memref<16x16x8xf32, #tpu.memory_space<vmem>>, vector<1x16x8xf32>,
    }
    %c16_i32_25 = arith.constant 16 : i32
    %43 = tpu.iota {dimensions = array<i32: 0>} : vector<7x16xi32>
    %44 = tpu.iota {dimensions = array<i32: 1>} : vector<7x16xi32>
    %c2_i32_26 = arith.constant 2 : i32
    %45 = vector.broadcast %c2_i32_26 : i32 to vector<7x16xi32>
    %46 = arith.muli %45, %43 : vector<7x16xi32>
    %c0_i32_27 = arith.constant 0 : i32
    %47 = vector.broadcast %c0_i32_27 : i32 to vector<7x16xi32>
    %48 = arith.addi %46, %47 : vector<7x16xi32>
    %49 = arith.cmpi eq, %44, %48 : vector<7x16xi32>
    %50 = arith.extui %49 : vector<7x16xi1> to vector<7x16xi32>
    %51 = arith.sitofp %50 : vector<7x16xi32> to vector<7x16xf32>
    %c2_i32_28 = arith.constant 2 : i32
    %52 = vector.broadcast %c2_i32_28 : i32 to vector<7x16xi32>
    %53 = arith.muli %52, %43 : vector<7x16xi32>
    %c1_i32_29 = arith.constant 1 : i32
    %54 = vector.broadcast %c1_i32_29 : i32 to vector<7x16xi32>
    %55 = arith.addi %53, %54 : vector<7x16xi32>
    %56 = arith.cmpi eq, %44, %55 : vector<7x16xi32>
    %57 = arith.extui %56 : vector<7x16xi1> to vector<7x16xi32>
    %58 = arith.sitofp %57 : vector<7x16xi32> to vector<7x16xf32>
    %c2_i32_30 = arith.constant 2 : i32
    %59 = vector.broadcast %c2_i32_30 : i32 to vector<7x16xi32>
    %60 = arith.muli %59, %43 : vector<7x16xi32>
    %c2_i32_31 = arith.constant 2 : i32
    %61 = vector.broadcast %c2_i32_31 : i32 to vector<7x16xi32>
    %62 = arith.addi %60, %61 : vector<7x16xi32>
    %63 = arith.cmpi eq, %44, %62 : vector<7x16xi32>
    %64 = arith.extui %63 : vector<7x16xi1> to vector<7x16xi32>
    %65 = arith.sitofp %64 : vector<7x16xi32> to vector<7x16xf32>
    %c0_32 = arith.constant 0 : index
    %c0_33 = arith.constant 0 : index
    %c0_34 = arith.constant 0 : index
    %66 = vector.load %arg4[%c0_32, %c0_33, %c0_34] : memref<9x8x16xf32, #tpu.memory_space<vmem>>, vector<1x8x16xf32>
    %67 = vector.shape_cast %66 : vector<1x8x16xf32> to vector<8x16xf32>
    %c1_35 = arith.constant 1 : index
    %c0_36 = arith.constant 0 : index
    %c0_37 = arith.constant 0 : index
    %68 = vector.load %arg4[%c1_35, %c0_36, %c0_37] : memref<9x8x16xf32, #tpu.memory_space<vmem>>, vector<1x8x16xf32>
    %69 = vector.shape_cast %68 : vector<1x8x16xf32> to vector<8x16xf32>
    %c2_38 = arith.constant 2 : index
    %c0_39 = arith.constant 0 : index
    %c0_40 = arith.constant 0 : index
    %70 = vector.load %arg4[%c2_38, %c0_39, %c0_40] : memref<9x8x16xf32, #tpu.memory_space<vmem>>, vector<1x8x16xf32>
    %71 = vector.shape_cast %70 : vector<1x8x16xf32> to vector<8x16xf32>
    %c3_41 = arith.constant 3 : index
    %c0_42 = arith.constant 0 : index
    %c0_43 = arith.constant 0 : index
    %72 = vector.load %arg4[%c3_41, %c0_42, %c0_43] : memref<9x8x16xf32, #tpu.memory_space<vmem>>, vector<1x8x16xf32>
    %73 = vector.shape_cast %72 : vector<1x8x16xf32> to vector<8x16xf32>
    %c4_44 = arith.constant 4 : index
    %c0_45 = arith.constant 0 : index
    %c0_46 = arith.constant 0 : index
    %74 = vector.load %arg4[%c4_44, %c0_45, %c0_46] : memref<9x8x16xf32, #tpu.memory_space<vmem>>, vector<1x8x16xf32>
    %75 = vector.shape_cast %74 : vector<1x8x16xf32> to vector<8x16xf32>
    %c5_47 = arith.constant 5 : index
    %c0_48 = arith.constant 0 : index
    %c0_49 = arith.constant 0 : index
    %76 = vector.load %arg4[%c5_47, %c0_48, %c0_49] : memref<9x8x16xf32, #tpu.memory_space<vmem>>, vector<1x8x16xf32>
    %77 = vector.shape_cast %76 : vector<1x8x16xf32> to vector<8x16xf32>
    %c6_50 = arith.constant 6 : index
    %c0_51 = arith.constant 0 : index
    %c0_52 = arith.constant 0 : index
    %78 = vector.load %arg4[%c6_50, %c0_51, %c0_52] : memref<9x8x16xf32, #tpu.memory_space<vmem>>, vector<1x8x16xf32>
    %79 = vector.shape_cast %78 : vector<1x8x16xf32> to vector<8x16xf32>
    %c7_53 = arith.constant 7 : index
    %c0_54 = arith.constant 0 : index
    %c0_55 = arith.constant 0 : index
    %80 = vector.load %arg4[%c7_53, %c0_54, %c0_55] : memref<9x8x16xf32, #tpu.memory_space<vmem>>, vector<1x8x16xf32>
    %81 = vector.shape_cast %80 : vector<1x8x16xf32> to vector<8x16xf32>
    %c8_56 = arith.constant 8 : index
    %c0_57 = arith.constant 0 : index
    %c0_58 = arith.constant 0 : index
    %82 = vector.load %arg4[%c8_56, %c0_57, %c0_58] : memref<9x8x16xf32, #tpu.memory_space<vmem>>, vector<1x8x16xf32>
    %83 = vector.shape_cast %82 : vector<1x8x16xf32> to vector<8x16xf32>
    %c0_59 = arith.constant 0 : index
    %c0_60 = arith.constant 0 : index
    %84 = vector.load %arg5[%c0_59, %c0_60] : memref<1x16xf32, #tpu.memory_space<vmem>>, vector<1x16xf32>
    %c0_i32_61 = arith.constant 0 : i32
    %c7_i32 = arith.constant 7 : i32
    %85 = arith.addi %c0_i32_61, %c7_i32 : i32
    %c1_i32_62 = arith.constant 1 : i32
    scf.for %arg16 = %c0_i32_61 to %85 step %c1_i32_62  : i32 {
      %cst_183 = arith.constant 0.000000e+00 : f32
      %231 = vector.broadcast %cst_183 : f32 to vector<7x16xf32>
      %c2_i32_184 = arith.constant 2 : i32
      %232 = arith.muli %c2_i32_184, %arg16 : i32
      %c0_i32_185 = arith.constant 0 : i32
      %233 = arith.addi %232, %c0_i32_185 : i32
      %234 = arith.index_cast %233 : i32 to index
      %c0_186 = arith.constant 0 : index
      %c0_187 = arith.constant 0 : index
      %235 = vector.load %arg12[%234, %c0_186, %c0_187] : memref<16x16x8xf32, #tpu.memory_space<vmem>>, vector<1x16x8xf32>
      %236 = vector.shape_cast %235 : vector<1x16x8xf32> to vector<16x8xf32>
      %cst_188 = arith.constant dense<0.000000e+00> : vector<16x16xf32>
      %237 = tpu.matmul %236, %67, %cst_188 {dimension_numbers = #tpu.dot_dimension_numbers<[1], [0], [0], [1], [0, 0, 1, 1], [], []>} : vector<16x8xf32>, vector<8x16xf32>, vector<16x16xf32> -> vector<16x16xf32>
      %cst_189 = arith.constant dense<0.000000e+00> : vector<7x16xf32>
      %238 = tpu.matmul %51, %237, %cst_189 {dimension_numbers = #tpu.dot_dimension_numbers<[1], [0], [0], [1], [0, 0, 1, 1], [], []>} : vector<7x16xf32>, vector<16x16xf32>, vector<7x16xf32> -> vector<7x16xf32>
      %239 = arith.addf %231, %238 : vector<7x16xf32>
      %cst_190 = arith.constant dense<0.000000e+00> : vector<16x16xf32>
      %240 = tpu.matmul %236, %69, %cst_190 {dimension_numbers = #tpu.dot_dimension_numbers<[1], [0], [0], [1], [0, 0, 1, 1], [], []>} : vector<16x8xf32>, vector<8x16xf32>, vector<16x16xf32> -> vector<16x16xf32>
      %cst_191 = arith.constant dense<0.000000e+00> : vector<7x16xf32>
      %241 = tpu.matmul %58, %240, %cst_191 {dimension_numbers = #tpu.dot_dimension_numbers<[1], [0], [0], [1], [0, 0, 1, 1], [], []>} : vector<7x16xf32>, vector<16x16xf32>, vector<7x16xf32> -> vector<7x16xf32>
      %242 = arith.addf %239, %241 : vector<7x16xf32>
      %cst_192 = arith.constant dense<0.000000e+00> : vector<16x16xf32>
      %243 = tpu.matmul %236, %71, %cst_192 {dimension_numbers = #tpu.dot_dimension_numbers<[1], [0], [0], [1], [0, 0, 1, 1], [], []>} : vector<16x8xf32>, vector<8x16xf32>, vector<16x16xf32> -> vector<16x16xf32>
      %cst_193 = arith.constant dense<0.000000e+00> : vector<7x16xf32>
      %244 = tpu.matmul %65, %243, %cst_193 {dimension_numbers = #tpu.dot_dimension_numbers<[1], [0], [0], [1], [0, 0, 1, 1], [], []>} : vector<7x16xf32>, vector<16x16xf32>, vector<7x16xf32> -> vector<7x16xf32>
      %245 = arith.addf %242, %244 : vector<7x16xf32>
      %c2_i32_194 = arith.constant 2 : i32
      %246 = arith.muli %c2_i32_194, %arg16 : i32
      %c1_i32_195 = arith.constant 1 : i32
      %247 = arith.addi %246, %c1_i32_195 : i32
      %248 = arith.index_cast %247 : i32 to index
      %c0_196 = arith.constant 0 : index
      %c0_197 = arith.constant 0 : index
      %249 = vector.load %arg12[%248, %c0_196, %c0_197] : memref<16x16x8xf32, #tpu.memory_space<vmem>>, vector<1x16x8xf32>
      %250 = vector.shape_cast %249 : vector<1x16x8xf32> to vector<16x8xf32>
      %cst_198 = arith.constant dense<0.000000e+00> : vector<16x16xf32>
      %251 = tpu.matmul %250, %73, %cst_198 {dimension_numbers = #tpu.dot_dimension_numbers<[1], [0], [0], [1], [0, 0, 1, 1], [], []>} : vector<16x8xf32>, vector<8x16xf32>, vector<16x16xf32> -> vector<16x16xf32>
      %cst_199 = arith.constant dense<0.000000e+00> : vector<7x16xf32>
      %252 = tpu.matmul %51, %251, %cst_199 {dimension_numbers = #tpu.dot_dimension_numbers<[1], [0], [0], [1], [0, 0, 1, 1], [], []>} : vector<7x16xf32>, vector<16x16xf32>, vector<7x16xf32> -> vector<7x16xf32>
      %253 = arith.addf %245, %252 : vector<7x16xf32>
      %cst_200 = arith.constant dense<0.000000e+00> : vector<16x16xf32>
      %254 = tpu.matmul %250, %75, %cst_200 {dimension_numbers = #tpu.dot_dimension_numbers<[1], [0], [0], [1], [0, 0, 1, 1], [], []>} : vector<16x8xf32>, vector<8x16xf32>, vector<16x16xf32> -> vector<16x16xf32>
      %cst_201 = arith.constant dense<0.000000e+00> : vector<7x16xf32>
      %255 = tpu.matmul %58, %254, %cst_201 {dimension_numbers = #tpu.dot_dimension_numbers<[1], [0], [0], [1], [0, 0, 1, 1], [], []>} : vector<7x16xf32>, vector<16x16xf32>, vector<7x16xf32> -> vector<7x16xf32>
      %256 = arith.addf %253, %255 : vector<7x16xf32>
      %cst_202 = arith.constant dense<0.000000e+00> : vector<16x16xf32>
      %257 = tpu.matmul %250, %77, %cst_202 {dimension_numbers = #tpu.dot_dimension_numbers<[1], [0], [0], [1], [0, 0, 1, 1], [], []>} : vector<16x8xf32>, vector<8x16xf32>, vector<16x16xf32> -> vector<16x16xf32>
      %cst_203 = arith.constant dense<0.000000e+00> : vector<7x16xf32>
      %258 = tpu.matmul %65, %257, %cst_203 {dimension_numbers = #tpu.dot_dimension_numbers<[1], [0], [0], [1], [0, 0, 1, 1], [], []>} : vector<7x16xf32>, vector<16x16xf32>, vector<7x16xf32> -> vector<7x16xf32>
      %259 = arith.addf %256, %258 : vector<7x16xf32>
      %c2_i32_204 = arith.constant 2 : i32
      %260 = arith.muli %c2_i32_204, %arg16 : i32
      %c2_i32_205 = arith.constant 2 : i32
      %261 = arith.addi %260, %c2_i32_205 : i32
      %262 = arith.index_cast %261 : i32 to index
      %c0_206 = arith.constant 0 : index
      %c0_207 = arith.constant 0 : index
      %263 = vector.load %arg12[%262, %c0_206, %c0_207] : memref<16x16x8xf32, #tpu.memory_space<vmem>>, vector<1x16x8xf32>
      %264 = vector.shape_cast %263 : vector<1x16x8xf32> to vector<16x8xf32>
      %cst_208 = arith.constant dense<0.000000e+00> : vector<16x16xf32>
      %265 = tpu.matmul %264, %79, %cst_208 {dimension_numbers = #tpu.dot_dimension_numbers<[1], [0], [0], [1], [0, 0, 1, 1], [], []>} : vector<16x8xf32>, vector<8x16xf32>, vector<16x16xf32> -> vector<16x16xf32>
      %cst_209 = arith.constant dense<0.000000e+00> : vector<7x16xf32>
      %266 = tpu.matmul %51, %265, %cst_209 {dimension_numbers = #tpu.dot_dimension_numbers<[1], [0], [0], [1], [0, 0, 1, 1], [], []>} : vector<7x16xf32>, vector<16x16xf32>, vector<7x16xf32> -> vector<7x16xf32>
      %267 = arith.addf %259, %266 : vector<7x16xf32>
      %cst_210 = arith.constant dense<0.000000e+00> : vector<16x16xf32>
      %268 = tpu.matmul %264, %81, %cst_210 {dimension_numbers = #tpu.dot_dimension_numbers<[1], [0], [0], [1], [0, 0, 1, 1], [], []>} : vector<16x8xf32>, vector<8x16xf32>, vector<16x16xf32> -> vector<16x16xf32>
      %cst_211 = arith.constant dense<0.000000e+00> : vector<7x16xf32>
      %269 = tpu.matmul %58, %268, %cst_211 {dimension_numbers = #tpu.dot_dimension_numbers<[1], [0], [0], [1], [0, 0, 1, 1], [], []>} : vector<7x16xf32>, vector<16x16xf32>, vector<7x16xf32> -> vector<7x16xf32>
      %270 = arith.addf %267, %269 : vector<7x16xf32>
      %cst_212 = arith.constant dense<0.000000e+00> : vector<16x16xf32>
      %271 = tpu.matmul %264, %83, %cst_212 {dimension_numbers = #tpu.dot_dimension_numbers<[1], [0], [0], [1], [0, 0, 1, 1], [], []>} : vector<16x8xf32>, vector<8x16xf32>, vector<16x16xf32> -> vector<16x16xf32>
      %cst_213 = arith.constant dense<0.000000e+00> : vector<7x16xf32>
      %272 = tpu.matmul %65, %271, %cst_213 {dimension_numbers = #tpu.dot_dimension_numbers<[1], [0], [0], [1], [0, 0, 1, 1], [], []>} : vector<7x16xf32>, vector<16x16xf32>, vector<7x16xf32> -> vector<7x16xf32>
      %273 = arith.addf %270, %272 : vector<7x16xf32>
      %274 = vector.broadcast %84 : vector<1x16xf32> to vector<7x16xf32>
      %275 = arith.addf %273, %274 : vector<7x16xf32>
      %cst_214 = arith.constant 0.000000e+00 : f32
      %276 = vector.broadcast %cst_214 : f32 to vector<7x16xf32>
      %277 = arith.maximumf %275, %276 : vector<7x16xf32>
      %278 = arith.index_cast %arg16 : i32 to index
      %c0_215 = arith.constant 0 : index
      %c0_216 = arith.constant 0 : index
      %279 = vector.load %arg13[%278, %c0_215, %c0_216] : memref<7x7x16xf32, #tpu.memory_space<vmem>>, vector<1x7x16xf32>
      %280 = vector.shape_cast %279 : vector<1x7x16xf32> to vector<7x16xf32>
      %281 = vector.shape_cast %277 : vector<7x16xf32> to vector<1x7x16xf32>
      tpu.vector_store %arg13[%278, %c0_215, %c0_216], %281 {strides = array<i32>} : memref<7x7x16xf32, #tpu.memory_space<vmem>>, vector<1x7x16xf32>,
    }
    %c7_i32_63 = arith.constant 7 : i32
    %86 = tpu.iota {dimensions = array<i32: 0>} : vector<3x7xi32>
    %87 = tpu.iota {dimensions = array<i32: 1>} : vector<3x7xi32>
    %c2_i32_64 = arith.constant 2 : i32
    %88 = vector.broadcast %c2_i32_64 : i32 to vector<3x7xi32>
    %89 = arith.muli %88, %86 : vector<3x7xi32>
    %c0_i32_65 = arith.constant 0 : i32
    %90 = vector.broadcast %c0_i32_65 : i32 to vector<3x7xi32>
    %91 = arith.addi %89, %90 : vector<3x7xi32>
    %92 = arith.cmpi eq, %87, %91 : vector<3x7xi32>
    %93 = arith.extui %92 : vector<3x7xi1> to vector<3x7xi32>
    %94 = arith.sitofp %93 : vector<3x7xi32> to vector<3x7xf32>
    %c2_i32_66 = arith.constant 2 : i32
    %95 = vector.broadcast %c2_i32_66 : i32 to vector<3x7xi32>
    %96 = arith.muli %95, %86 : vector<3x7xi32>
    %c1_i32_67 = arith.constant 1 : i32
    %97 = vector.broadcast %c1_i32_67 : i32 to vector<3x7xi32>
    %98 = arith.addi %96, %97 : vector<3x7xi32>
    %99 = arith.cmpi eq, %87, %98 : vector<3x7xi32>
    %100 = arith.extui %99 : vector<3x7xi1> to vector<3x7xi32>
    %101 = arith.sitofp %100 : vector<3x7xi32> to vector<3x7xf32>
    %c2_i32_68 = arith.constant 2 : i32
    %102 = vector.broadcast %c2_i32_68 : i32 to vector<3x7xi32>
    %103 = arith.muli %102, %86 : vector<3x7xi32>
    %c2_i32_69 = arith.constant 2 : i32
    %104 = vector.broadcast %c2_i32_69 : i32 to vector<3x7xi32>
    %105 = arith.addi %103, %104 : vector<3x7xi32>
    %106 = arith.cmpi eq, %87, %105 : vector<3x7xi32>
    %107 = arith.extui %106 : vector<3x7xi1> to vector<3x7xi32>
    %108 = arith.sitofp %107 : vector<3x7xi32> to vector<3x7xf32>
    %c0_70 = arith.constant 0 : index
    %c0_71 = arith.constant 0 : index
    %c0_72 = arith.constant 0 : index
    %109 = vector.load %arg6[%c0_70, %c0_71, %c0_72] : memref<9x16x32xf32, #tpu.memory_space<vmem>>, vector<1x16x32xf32>
    %110 = vector.shape_cast %109 : vector<1x16x32xf32> to vector<16x32xf32>
    %c1_73 = arith.constant 1 : index
    %c0_74 = arith.constant 0 : index
    %c0_75 = arith.constant 0 : index
    %111 = vector.load %arg6[%c1_73, %c0_74, %c0_75] : memref<9x16x32xf32, #tpu.memory_space<vmem>>, vector<1x16x32xf32>
    %112 = vector.shape_cast %111 : vector<1x16x32xf32> to vector<16x32xf32>
    %c2_76 = arith.constant 2 : index
    %c0_77 = arith.constant 0 : index
    %c0_78 = arith.constant 0 : index
    %113 = vector.load %arg6[%c2_76, %c0_77, %c0_78] : memref<9x16x32xf32, #tpu.memory_space<vmem>>, vector<1x16x32xf32>
    %114 = vector.shape_cast %113 : vector<1x16x32xf32> to vector<16x32xf32>
    %c3_79 = arith.constant 3 : index
    %c0_80 = arith.constant 0 : index
    %c0_81 = arith.constant 0 : index
    %115 = vector.load %arg6[%c3_79, %c0_80, %c0_81] : memref<9x16x32xf32, #tpu.memory_space<vmem>>, vector<1x16x32xf32>
    %116 = vector.shape_cast %115 : vector<1x16x32xf32> to vector<16x32xf32>
    %c4_82 = arith.constant 4 : index
    %c0_83 = arith.constant 0 : index
    %c0_84 = arith.constant 0 : index
    %117 = vector.load %arg6[%c4_82, %c0_83, %c0_84] : memref<9x16x32xf32, #tpu.memory_space<vmem>>, vector<1x16x32xf32>
    %118 = vector.shape_cast %117 : vector<1x16x32xf32> to vector<16x32xf32>
    %c5_85 = arith.constant 5 : index
    %c0_86 = arith.constant 0 : index
    %c0_87 = arith.constant 0 : index
    %119 = vector.load %arg6[%c5_85, %c0_86, %c0_87] : memref<9x16x32xf32, #tpu.memory_space<vmem>>, vector<1x16x32xf32>
    %120 = vector.shape_cast %119 : vector<1x16x32xf32> to vector<16x32xf32>
    %c6_88 = arith.constant 6 : index
    %c0_89 = arith.constant 0 : index
    %c0_90 = arith.constant 0 : index
    %121 = vector.load %arg6[%c6_88, %c0_89, %c0_90] : memref<9x16x32xf32, #tpu.memory_space<vmem>>, vector<1x16x32xf32>
    %122 = vector.shape_cast %121 : vector<1x16x32xf32> to vector<16x32xf32>
    %c7_91 = arith.constant 7 : index
    %c0_92 = arith.constant 0 : index
    %c0_93 = arith.constant 0 : index
    %123 = vector.load %arg6[%c7_91, %c0_92, %c0_93] : memref<9x16x32xf32, #tpu.memory_space<vmem>>, vector<1x16x32xf32>
    %124 = vector.shape_cast %123 : vector<1x16x32xf32> to vector<16x32xf32>
    %c8_94 = arith.constant 8 : index
    %c0_95 = arith.constant 0 : index
    %c0_96 = arith.constant 0 : index
    %125 = vector.load %arg6[%c8_94, %c0_95, %c0_96] : memref<9x16x32xf32, #tpu.memory_space<vmem>>, vector<1x16x32xf32>
    %126 = vector.shape_cast %125 : vector<1x16x32xf32> to vector<16x32xf32>
    %c0_97 = arith.constant 0 : index
    %c0_98 = arith.constant 0 : index
    %127 = vector.load %arg7[%c0_97, %c0_98] : memref<1x32xf32, #tpu.memory_space<vmem>>, vector<1x32xf32>
    %c0_i32_99 = arith.constant 0 : i32
    %c3_i32 = arith.constant 3 : i32
    %128 = arith.addi %c0_i32_99, %c3_i32 : i32
    %c1_i32_100 = arith.constant 1 : i32
    scf.for %arg16 = %c0_i32_99 to %128 step %c1_i32_100  : i32 {
      %cst_183 = arith.constant 0.000000e+00 : f32
      %231 = vector.broadcast %cst_183 : f32 to vector<3x32xf32>
      %c2_i32_184 = arith.constant 2 : i32
      %232 = arith.muli %c2_i32_184, %arg16 : i32
      %c0_i32_185 = arith.constant 0 : i32
      %233 = arith.addi %232, %c0_i32_185 : i32
      %234 = arith.index_cast %233 : i32 to index
      %c0_186 = arith.constant 0 : index
      %c0_187 = arith.constant 0 : index
      %235 = vector.load %arg13[%234, %c0_186, %c0_187] : memref<7x7x16xf32, #tpu.memory_space<vmem>>, vector<1x7x16xf32>
      %236 = vector.shape_cast %235 : vector<1x7x16xf32> to vector<7x16xf32>
      %cst_188 = arith.constant dense<0.000000e+00> : vector<7x32xf32>
      %237 = tpu.matmul %236, %110, %cst_188 {dimension_numbers = #tpu.dot_dimension_numbers<[1], [0], [0], [1], [0, 0, 1, 1], [], []>} : vector<7x16xf32>, vector<16x32xf32>, vector<7x32xf32> -> vector<7x32xf32>
      %cst_189 = arith.constant dense<0.000000e+00> : vector<3x32xf32>
      %238 = tpu.matmul %94, %237, %cst_189 {dimension_numbers = #tpu.dot_dimension_numbers<[1], [0], [0], [1], [0, 0, 1, 1], [], []>} : vector<3x7xf32>, vector<7x32xf32>, vector<3x32xf32> -> vector<3x32xf32>
      %239 = arith.addf %231, %238 : vector<3x32xf32>
      %cst_190 = arith.constant dense<0.000000e+00> : vector<7x32xf32>
      %240 = tpu.matmul %236, %112, %cst_190 {dimension_numbers = #tpu.dot_dimension_numbers<[1], [0], [0], [1], [0, 0, 1, 1], [], []>} : vector<7x16xf32>, vector<16x32xf32>, vector<7x32xf32> -> vector<7x32xf32>
      %cst_191 = arith.constant dense<0.000000e+00> : vector<3x32xf32>
      %241 = tpu.matmul %101, %240, %cst_191 {dimension_numbers = #tpu.dot_dimension_numbers<[1], [0], [0], [1], [0, 0, 1, 1], [], []>} : vector<3x7xf32>, vector<7x32xf32>, vector<3x32xf32> -> vector<3x32xf32>
      %242 = arith.addf %239, %241 : vector<3x32xf32>
      %cst_192 = arith.constant dense<0.000000e+00> : vector<7x32xf32>
      %243 = tpu.matmul %236, %114, %cst_192 {dimension_numbers = #tpu.dot_dimension_numbers<[1], [0], [0], [1], [0, 0, 1, 1], [], []>} : vector<7x16xf32>, vector<16x32xf32>, vector<7x32xf32> -> vector<7x32xf32>
      %cst_193 = arith.constant dense<0.000000e+00> : vector<3x32xf32>
      %244 = tpu.matmul %108, %243, %cst_193 {dimension_numbers = #tpu.dot_dimension_numbers<[1], [0], [0], [1], [0, 0, 1, 1], [], []>} : vector<3x7xf32>, vector<7x32xf32>, vector<3x32xf32> -> vector<3x32xf32>
      %245 = arith.addf %242, %244 : vector<3x32xf32>
      %c2_i32_194 = arith.constant 2 : i32
      %246 = arith.muli %c2_i32_194, %arg16 : i32
      %c1_i32_195 = arith.constant 1 : i32
      %247 = arith.addi %246, %c1_i32_195 : i32
      %248 = arith.index_cast %247 : i32 to index
      %c0_196 = arith.constant 0 : index
      %c0_197 = arith.constant 0 : index
      %249 = vector.load %arg13[%248, %c0_196, %c0_197] : memref<7x7x16xf32, #tpu.memory_space<vmem>>, vector<1x7x16xf32>
      %250 = vector.shape_cast %249 : vector<1x7x16xf32> to vector<7x16xf32>
      %cst_198 = arith.constant dense<0.000000e+00> : vector<7x32xf32>
      %251 = tpu.matmul %250, %116, %cst_198 {dimension_numbers = #tpu.dot_dimension_numbers<[1], [0], [0], [1], [0, 0, 1, 1], [], []>} : vector<7x16xf32>, vector<16x32xf32>, vector<7x32xf32> -> vector<7x32xf32>
      %cst_199 = arith.constant dense<0.000000e+00> : vector<3x32xf32>
      %252 = tpu.matmul %94, %251, %cst_199 {dimension_numbers = #tpu.dot_dimension_numbers<[1], [0], [0], [1], [0, 0, 1, 1], [], []>} : vector<3x7xf32>, vector<7x32xf32>, vector<3x32xf32> -> vector<3x32xf32>
      %253 = arith.addf %245, %252 : vector<3x32xf32>
      %cst_200 = arith.constant dense<0.000000e+00> : vector<7x32xf32>
      %254 = tpu.matmul %250, %118, %cst_200 {dimension_numbers = #tpu.dot_dimension_numbers<[1], [0], [0], [1], [0, 0, 1, 1], [], []>} : vector<7x16xf32>, vector<16x32xf32>, vector<7x32xf32> -> vector<7x32xf32>
      %cst_201 = arith.constant dense<0.000000e+00> : vector<3x32xf32>
      %255 = tpu.matmul %101, %254, %cst_201 {dimension_numbers = #tpu.dot_dimension_numbers<[1], [0], [0], [1], [0, 0, 1, 1], [], []>} : vector<3x7xf32>, vector<7x32xf32>, vector<3x32xf32> -> vector<3x32xf32>
      %256 = arith.addf %253, %255 : vector<3x32xf32>
      %cst_202 = arith.constant dense<0.000000e+00> : vector<7x32xf32>
      %257 = tpu.matmul %250, %120, %cst_202 {dimension_numbers = #tpu.dot_dimension_numbers<[1], [0], [0], [1], [0, 0, 1, 1], [], []>} : vector<7x16xf32>, vector<16x32xf32>, vector<7x32xf32> -> vector<7x32xf32>
      %cst_203 = arith.constant dense<0.000000e+00> : vector<3x32xf32>
      %258 = tpu.matmul %108, %257, %cst_203 {dimension_numbers = #tpu.dot_dimension_numbers<[1], [0], [0], [1], [0, 0, 1, 1], [], []>} : vector<3x7xf32>, vector<7x32xf32>, vector<3x32xf32> -> vector<3x32xf32>
      %259 = arith.addf %256, %258 : vector<3x32xf32>
      %c2_i32_204 = arith.constant 2 : i32
      %260 = arith.muli %c2_i32_204, %arg16 : i32
      %c2_i32_205 = arith.constant 2 : i32
      %261 = arith.addi %260, %c2_i32_205 : i32
      %262 = arith.index_cast %261 : i32 to index
      %c0_206 = arith.constant 0 : index
      %c0_207 = arith.constant 0 : index
      %263 = vector.load %arg13[%262, %c0_206, %c0_207] : memref<7x7x16xf32, #tpu.memory_space<vmem>>, vector<1x7x16xf32>
      %264 = vector.shape_cast %263 : vector<1x7x16xf32> to vector<7x16xf32>
      %cst_208 = arith.constant dense<0.000000e+00> : vector<7x32xf32>
      %265 = tpu.matmul %264, %122, %cst_208 {dimension_numbers = #tpu.dot_dimension_numbers<[1], [0], [0], [1], [0, 0, 1, 1], [], []>} : vector<7x16xf32>, vector<16x32xf32>, vector<7x32xf32> -> vector<7x32xf32>
      %cst_209 = arith.constant dense<0.000000e+00> : vector<3x32xf32>
      %266 = tpu.matmul %94, %265, %cst_209 {dimension_numbers = #tpu.dot_dimension_numbers<[1], [0], [0], [1], [0, 0, 1, 1], [], []>} : vector<3x7xf32>, vector<7x32xf32>, vector<3x32xf32> -> vector<3x32xf32>
      %267 = arith.addf %259, %266 : vector<3x32xf32>
      %cst_210 = arith.constant dense<0.000000e+00> : vector<7x32xf32>
      %268 = tpu.matmul %264, %124, %cst_210 {dimension_numbers = #tpu.dot_dimension_numbers<[1], [0], [0], [1], [0, 0, 1, 1], [], []>} : vector<7x16xf32>, vector<16x32xf32>, vector<7x32xf32> -> vector<7x32xf32>
      %cst_211 = arith.constant dense<0.000000e+00> : vector<3x32xf32>
      %269 = tpu.matmul %101, %268, %cst_211 {dimension_numbers = #tpu.dot_dimension_numbers<[1], [0], [0], [1], [0, 0, 1, 1], [], []>} : vector<3x7xf32>, vector<7x32xf32>, vector<3x32xf32> -> vector<3x32xf32>
      %270 = arith.addf %267, %269 : vector<3x32xf32>
      %cst_212 = arith.constant dense<0.000000e+00> : vector<7x32xf32>
      %271 = tpu.matmul %264, %126, %cst_212 {dimension_numbers = #tpu.dot_dimension_numbers<[1], [0], [0], [1], [0, 0, 1, 1], [], []>} : vector<7x16xf32>, vector<16x32xf32>, vector<7x32xf32> -> vector<7x32xf32>
      %cst_213 = arith.constant dense<0.000000e+00> : vector<3x32xf32>
      %272 = tpu.matmul %108, %271, %cst_213 {dimension_numbers = #tpu.dot_dimension_numbers<[1], [0], [0], [1], [0, 0, 1, 1], [], []>} : vector<3x7xf32>, vector<7x32xf32>, vector<3x32xf32> -> vector<3x32xf32>
      %273 = arith.addf %270, %272 : vector<3x32xf32>
      %274 = vector.broadcast %127 : vector<1x32xf32> to vector<3x32xf32>
      %275 = arith.addf %273, %274 : vector<3x32xf32>
      %cst_214 = arith.constant 0.000000e+00 : f32
      %276 = vector.broadcast %cst_214 : f32 to vector<3x32xf32>
      %277 = arith.maximumf %275, %276 : vector<3x32xf32>
      %278 = arith.index_cast %arg16 : i32 to index
      %c0_215 = arith.constant 0 : index
      %c0_216 = arith.constant 0 : index
      %279 = vector.load %arg14[%278, %c0_215, %c0_216] : memref<3x3x32xf32, #tpu.memory_space<vmem>>, vector<1x3x32xf32>
      %280 = vector.shape_cast %279 : vector<1x3x32xf32> to vector<3x32xf32>
      %281 = vector.shape_cast %277 : vector<3x32xf32> to vector<1x3x32xf32>
      tpu.vector_store %arg14[%278, %c0_215, %c0_216], %281 {strides = array<i32>} : memref<3x3x32xf32, #tpu.memory_space<vmem>>, vector<1x3x32xf32>,
    }
    %c3_i32_101 = arith.constant 3 : i32
    %129 = tpu.iota {dimensions = array<i32: 0>} : vector<1x3xi32>
    %130 = tpu.iota {dimensions = array<i32: 1>} : vector<1x3xi32>
    %c2_i32_102 = arith.constant 2 : i32
    %131 = vector.broadcast %c2_i32_102 : i32 to vector<1x3xi32>
    %132 = arith.muli %131, %129 : vector<1x3xi32>
    %c0_i32_103 = arith.constant 0 : i32
    %133 = vector.broadcast %c0_i32_103 : i32 to vector<1x3xi32>
    %134 = arith.addi %132, %133 : vector<1x3xi32>
    %135 = arith.cmpi eq, %130, %134 : vector<1x3xi32>
    %136 = arith.extui %135 : vector<1x3xi1> to vector<1x3xi32>
    %137 = arith.sitofp %136 : vector<1x3xi32> to vector<1x3xf32>
    %c2_i32_104 = arith.constant 2 : i32
    %138 = vector.broadcast %c2_i32_104 : i32 to vector<1x3xi32>
    %139 = arith.muli %138, %129 : vector<1x3xi32>
    %c1_i32_105 = arith.constant 1 : i32
    %140 = vector.broadcast %c1_i32_105 : i32 to vector<1x3xi32>
    %141 = arith.addi %139, %140 : vector<1x3xi32>
    %142 = arith.cmpi eq, %130, %141 : vector<1x3xi32>
    %143 = arith.extui %142 : vector<1x3xi1> to vector<1x3xi32>
    %144 = arith.sitofp %143 : vector<1x3xi32> to vector<1x3xf32>
    %c2_i32_106 = arith.constant 2 : i32
    %145 = vector.broadcast %c2_i32_106 : i32 to vector<1x3xi32>
    %146 = arith.muli %145, %129 : vector<1x3xi32>
    %c2_i32_107 = arith.constant 2 : i32
    %147 = vector.broadcast %c2_i32_107 : i32 to vector<1x3xi32>
    %148 = arith.addi %146, %147 : vector<1x3xi32>
    %149 = arith.cmpi eq, %130, %148 : vector<1x3xi32>
    %150 = arith.extui %149 : vector<1x3xi1> to vector<1x3xi32>
    %151 = arith.sitofp %150 : vector<1x3xi32> to vector<1x3xf32>
    %c0_108 = arith.constant 0 : index
    %c0_109 = arith.constant 0 : index
    %c0_110 = arith.constant 0 : index
    %152 = vector.load %arg8[%c0_108, %c0_109, %c0_110] : memref<9x32x32xf32, #tpu.memory_space<vmem>>, vector<1x32x32xf32>
    %153 = vector.shape_cast %152 : vector<1x32x32xf32> to vector<32x32xf32>
    %c1_111 = arith.constant 1 : index
    %c0_112 = arith.constant 0 : index
    %c0_113 = arith.constant 0 : index
    %154 = vector.load %arg8[%c1_111, %c0_112, %c0_113] : memref<9x32x32xf32, #tpu.memory_space<vmem>>, vector<1x32x32xf32>
    %155 = vector.shape_cast %154 : vector<1x32x32xf32> to vector<32x32xf32>
    %c2_114 = arith.constant 2 : index
    %c0_115 = arith.constant 0 : index
    %c0_116 = arith.constant 0 : index
    %156 = vector.load %arg8[%c2_114, %c0_115, %c0_116] : memref<9x32x32xf32, #tpu.memory_space<vmem>>, vector<1x32x32xf32>
    %157 = vector.shape_cast %156 : vector<1x32x32xf32> to vector<32x32xf32>
    %c3_117 = arith.constant 3 : index
    %c0_118 = arith.constant 0 : index
    %c0_119 = arith.constant 0 : index
    %158 = vector.load %arg8[%c3_117, %c0_118, %c0_119] : memref<9x32x32xf32, #tpu.memory_space<vmem>>, vector<1x32x32xf32>
    %159 = vector.shape_cast %158 : vector<1x32x32xf32> to vector<32x32xf32>
    %c4_120 = arith.constant 4 : index
    %c0_121 = arith.constant 0 : index
    %c0_122 = arith.constant 0 : index
    %160 = vector.load %arg8[%c4_120, %c0_121, %c0_122] : memref<9x32x32xf32, #tpu.memory_space<vmem>>, vector<1x32x32xf32>
    %161 = vector.shape_cast %160 : vector<1x32x32xf32> to vector<32x32xf32>
    %c5_123 = arith.constant 5 : index
    %c0_124 = arith.constant 0 : index
    %c0_125 = arith.constant 0 : index
    %162 = vector.load %arg8[%c5_123, %c0_124, %c0_125] : memref<9x32x32xf32, #tpu.memory_space<vmem>>, vector<1x32x32xf32>
    %163 = vector.shape_cast %162 : vector<1x32x32xf32> to vector<32x32xf32>
    %c6_126 = arith.constant 6 : index
    %c0_127 = arith.constant 0 : index
    %c0_128 = arith.constant 0 : index
    %164 = vector.load %arg8[%c6_126, %c0_127, %c0_128] : memref<9x32x32xf32, #tpu.memory_space<vmem>>, vector<1x32x32xf32>
    %165 = vector.shape_cast %164 : vector<1x32x32xf32> to vector<32x32xf32>
    %c7_129 = arith.constant 7 : index
    %c0_130 = arith.constant 0 : index
    %c0_131 = arith.constant 0 : index
    %166 = vector.load %arg8[%c7_129, %c0_130, %c0_131] : memref<9x32x32xf32, #tpu.memory_space<vmem>>, vector<1x32x32xf32>
    %167 = vector.shape_cast %166 : vector<1x32x32xf32> to vector<32x32xf32>
    %c8_132 = arith.constant 8 : index
    %c0_133 = arith.constant 0 : index
    %c0_134 = arith.constant 0 : index
    %168 = vector.load %arg8[%c8_132, %c0_133, %c0_134] : memref<9x32x32xf32, #tpu.memory_space<vmem>>, vector<1x32x32xf32>
    %169 = vector.shape_cast %168 : vector<1x32x32xf32> to vector<32x32xf32>
    %c0_135 = arith.constant 0 : index
    %c0_136 = arith.constant 0 : index
    %170 = vector.load %arg9[%c0_135, %c0_136] : memref<1x32xf32, #tpu.memory_space<vmem>>, vector<1x32xf32>
    %c0_i32_137 = arith.constant 0 : i32
    %cst = arith.constant 0.000000e+00 : f32
    %171 = vector.broadcast %cst : f32 to vector<1x32xf32>
    %c2_i32_138 = arith.constant 2 : i32
    %172 = arith.muli %c2_i32_138, %c0_i32_137 : i32
    %c0_i32_139 = arith.constant 0 : i32
    %173 = arith.addi %172, %c0_i32_139 : i32
    %174 = arith.index_cast %173 : i32 to index
    %c0_140 = arith.constant 0 : index
    %c0_141 = arith.constant 0 : index
    %175 = vector.load %arg14[%174, %c0_140, %c0_141] : memref<3x3x32xf32, #tpu.memory_space<vmem>>, vector<1x3x32xf32>
    %176 = vector.shape_cast %175 : vector<1x3x32xf32> to vector<3x32xf32>
    %cst_142 = arith.constant dense<0.000000e+00> : vector<3x32xf32>
    %177 = tpu.matmul %176, %153, %cst_142 {dimension_numbers = #tpu.dot_dimension_numbers<[1], [0], [0], [1], [0, 0, 1, 1], [], []>} : vector<3x32xf32>, vector<32x32xf32>, vector<3x32xf32> -> vector<3x32xf32>
    %cst_143 = arith.constant dense<0.000000e+00> : vector<1x32xf32>
    %178 = tpu.matmul %137, %177, %cst_143 {dimension_numbers = #tpu.dot_dimension_numbers<[1], [0], [0], [1], [0, 0, 1, 1], [], []>} : vector<1x3xf32>, vector<3x32xf32>, vector<1x32xf32> -> vector<1x32xf32>
    %179 = arith.addf %171, %178 : vector<1x32xf32>
    %cst_144 = arith.constant dense<0.000000e+00> : vector<3x32xf32>
    %180 = tpu.matmul %176, %155, %cst_144 {dimension_numbers = #tpu.dot_dimension_numbers<[1], [0], [0], [1], [0, 0, 1, 1], [], []>} : vector<3x32xf32>, vector<32x32xf32>, vector<3x32xf32> -> vector<3x32xf32>
    %cst_145 = arith.constant dense<0.000000e+00> : vector<1x32xf32>
    %181 = tpu.matmul %144, %180, %cst_145 {dimension_numbers = #tpu.dot_dimension_numbers<[1], [0], [0], [1], [0, 0, 1, 1], [], []>} : vector<1x3xf32>, vector<3x32xf32>, vector<1x32xf32> -> vector<1x32xf32>
    %182 = arith.addf %179, %181 : vector<1x32xf32>
    %cst_146 = arith.constant dense<0.000000e+00> : vector<3x32xf32>
    %183 = tpu.matmul %176, %157, %cst_146 {dimension_numbers = #tpu.dot_dimension_numbers<[1], [0], [0], [1], [0, 0, 1, 1], [], []>} : vector<3x32xf32>, vector<32x32xf32>, vector<3x32xf32> -> vector<3x32xf32>
    %cst_147 = arith.constant dense<0.000000e+00> : vector<1x32xf32>
    %184 = tpu.matmul %151, %183, %cst_147 {dimension_numbers = #tpu.dot_dimension_numbers<[1], [0], [0], [1], [0, 0, 1, 1], [], []>} : vector<1x3xf32>, vector<3x32xf32>, vector<1x32xf32> -> vector<1x32xf32>
    %185 = arith.addf %182, %184 : vector<1x32xf32>
    %c2_i32_148 = arith.constant 2 : i32
    %186 = arith.muli %c2_i32_148, %c0_i32_137 : i32
    %c1_i32_149 = arith.constant 1 : i32
    %187 = arith.addi %186, %c1_i32_149 : i32
    %188 = arith.index_cast %187 : i32 to index
    %c0_150 = arith.constant 0 : index
    %c0_151 = arith.constant 0 : index
    %189 = vector.load %arg14[%188, %c0_150, %c0_151] : memref<3x3x32xf32, #tpu.memory_space<vmem>>, vector<1x3x32xf32>
    %190 = vector.shape_cast %189 : vector<1x3x32xf32> to vector<3x32xf32>
    %cst_152 = arith.constant dense<0.000000e+00> : vector<3x32xf32>
    %191 = tpu.matmul %190, %159, %cst_152 {dimension_numbers = #tpu.dot_dimension_numbers<[1], [0], [0], [1], [0, 0, 1, 1], [], []>} : vector<3x32xf32>, vector<32x32xf32>, vector<3x32xf32> -> vector<3x32xf32>
    %cst_153 = arith.constant dense<0.000000e+00> : vector<1x32xf32>
    %192 = tpu.matmul %137, %191, %cst_153 {dimension_numbers = #tpu.dot_dimension_numbers<[1], [0], [0], [1], [0, 0, 1, 1], [], []>} : vector<1x3xf32>, vector<3x32xf32>, vector<1x32xf32> -> vector<1x32xf32>
    %193 = arith.addf %185, %192 : vector<1x32xf32>
    %cst_154 = arith.constant dense<0.000000e+00> : vector<3x32xf32>
    %194 = tpu.matmul %190, %161, %cst_154 {dimension_numbers = #tpu.dot_dimension_numbers<[1], [0], [0], [1], [0, 0, 1, 1], [], []>} : vector<3x32xf32>, vector<32x32xf32>, vector<3x32xf32> -> vector<3x32xf32>
    %cst_155 = arith.constant dense<0.000000e+00> : vector<1x32xf32>
    %195 = tpu.matmul %144, %194, %cst_155 {dimension_numbers = #tpu.dot_dimension_numbers<[1], [0], [0], [1], [0, 0, 1, 1], [], []>} : vector<1x3xf32>, vector<3x32xf32>, vector<1x32xf32> -> vector<1x32xf32>
    %196 = arith.addf %193, %195 : vector<1x32xf32>
    %cst_156 = arith.constant dense<0.000000e+00> : vector<3x32xf32>
    %197 = tpu.matmul %190, %163, %cst_156 {dimension_numbers = #tpu.dot_dimension_numbers<[1], [0], [0], [1], [0, 0, 1, 1], [], []>} : vector<3x32xf32>, vector<32x32xf32>, vector<3x32xf32> -> vector<3x32xf32>
    %cst_157 = arith.constant dense<0.000000e+00> : vector<1x32xf32>
    %198 = tpu.matmul %151, %197, %cst_157 {dimension_numbers = #tpu.dot_dimension_numbers<[1], [0], [0], [1], [0, 0, 1, 1], [], []>} : vector<1x3xf32>, vector<3x32xf32>, vector<1x32xf32> -> vector<1x32xf32>
    %199 = arith.addf %196, %198 : vector<1x32xf32>
    %c2_i32_158 = arith.constant 2 : i32
    %200 = arith.muli %c2_i32_158, %c0_i32_137 : i32
    %c2_i32_159 = arith.constant 2 : i32
    %201 = arith.addi %200, %c2_i32_159 : i32
    %202 = arith.index_cast %201 : i32 to index
    %c0_160 = arith.constant 0 : index
    %c0_161 = arith.constant 0 : index
    %203 = vector.load %arg14[%202, %c0_160, %c0_161] : memref<3x3x32xf32, #tpu.memory_space<vmem>>, vector<1x3x32xf32>
    %204 = vector.shape_cast %203 : vector<1x3x32xf32> to vector<3x32xf32>
    %cst_162 = arith.constant dense<0.000000e+00> : vector<3x32xf32>
    %205 = tpu.matmul %204, %165, %cst_162 {dimension_numbers = #tpu.dot_dimension_numbers<[1], [0], [0], [1], [0, 0, 1, 1], [], []>} : vector<3x32xf32>, vector<32x32xf32>, vector<3x32xf32> -> vector<3x32xf32>
    %cst_163 = arith.constant dense<0.000000e+00> : vector<1x32xf32>
    %206 = tpu.matmul %137, %205, %cst_163 {dimension_numbers = #tpu.dot_dimension_numbers<[1], [0], [0], [1], [0, 0, 1, 1], [], []>} : vector<1x3xf32>, vector<3x32xf32>, vector<1x32xf32> -> vector<1x32xf32>
    %207 = arith.addf %199, %206 : vector<1x32xf32>
    %cst_164 = arith.constant dense<0.000000e+00> : vector<3x32xf32>
    %208 = tpu.matmul %204, %167, %cst_164 {dimension_numbers = #tpu.dot_dimension_numbers<[1], [0], [0], [1], [0, 0, 1, 1], [], []>} : vector<3x32xf32>, vector<32x32xf32>, vector<3x32xf32> -> vector<3x32xf32>
    %cst_165 = arith.constant dense<0.000000e+00> : vector<1x32xf32>
    %209 = tpu.matmul %144, %208, %cst_165 {dimension_numbers = #tpu.dot_dimension_numbers<[1], [0], [0], [1], [0, 0, 1, 1], [], []>} : vector<1x3xf32>, vector<3x32xf32>, vector<1x32xf32> -> vector<1x32xf32>
    %210 = arith.addf %207, %209 : vector<1x32xf32>
    %cst_166 = arith.constant dense<0.000000e+00> : vector<3x32xf32>
    %211 = tpu.matmul %204, %169, %cst_166 {dimension_numbers = #tpu.dot_dimension_numbers<[1], [0], [0], [1], [0, 0, 1, 1], [], []>} : vector<3x32xf32>, vector<32x32xf32>, vector<3x32xf32> -> vector<3x32xf32>
    %cst_167 = arith.constant dense<0.000000e+00> : vector<1x32xf32>
    %212 = tpu.matmul %151, %211, %cst_167 {dimension_numbers = #tpu.dot_dimension_numbers<[1], [0], [0], [1], [0, 0, 1, 1], [], []>} : vector<1x3xf32>, vector<3x32xf32>, vector<1x32xf32> -> vector<1x32xf32>
    %213 = arith.addf %210, %212 : vector<1x32xf32>
    %214 = arith.addf %213, %170 : vector<1x32xf32>
    %cst_168 = arith.constant 0.000000e+00 : f32
    %215 = vector.broadcast %cst_168 : f32 to vector<1x32xf32>
    %216 = arith.maximumf %214, %215 : vector<1x32xf32>
    %217 = arith.index_cast %c0_i32_137 : i32 to index
    %c0_169 = arith.constant 0 : index
    %c0_170 = arith.constant 0 : index
    %218 = vector.load %arg15[%217, %c0_169, %c0_170] : memref<1x1x32xf32, #tpu.memory_space<vmem>>, vector<1x1x32xf32>
    %219 = vector.shape_cast %218 : vector<1x1x32xf32> to vector<1x32xf32>
    %220 = vector.shape_cast %216 : vector<1x32xf32> to vector<1x1x32xf32>
    tpu.vector_store %arg15[%217, %c0_169, %c0_170], %220 {strides = array<i32>} : memref<1x1x32xf32, #tpu.memory_space<vmem>>, vector<1x1x32xf32>,
    %c1_i32_171 = arith.constant 1 : i32
    %cst_172 = arith.constant 0.000000e+00 : f32
    %221 = vector.broadcast %cst_172 : f32 to vector<1x128xf32>
    %c0_173 = arith.constant 0 : index
    %c0_174 = arith.constant 0 : index
    %c0_175 = arith.constant 0 : index
    %222 = vector.load %arg15[%c0_173, %c0_174, %c0_175] : memref<1x1x32xf32, #tpu.memory_space<vmem>>, vector<1x1x32xf32>
    %223 = vector.shape_cast %222 : vector<1x1x32xf32> to vector<1x32xf32>
    %c0_176 = arith.constant 0 : index
    %c0_177 = arith.constant 0 : index
    %c0_178 = arith.constant 0 : index
    %224 = vector.load %arg10[%c0_176, %c0_177, %c0_178] : memref<1x32x128xf32, #tpu.memory_space<vmem>>, vector<1x32x128xf32>
    %225 = vector.shape_cast %224 : vector<1x32x128xf32> to vector<32x128xf32>
    %cst_179 = arith.constant dense<0.000000e+00> : vector<1x128xf32>
    %226 = tpu.matmul %223, %225, %cst_179 {dimension_numbers = #tpu.dot_dimension_numbers<[1], [0], [0], [1], [0, 0, 1, 1], [], []>} : vector<1x32xf32>, vector<32x128xf32>, vector<1x128xf32> -> vector<1x128xf32>
    %227 = arith.addf %221, %226 : vector<1x128xf32>
    %c0_180 = arith.constant 0 : index
    %c0_181 = arith.constant 0 : index
    %c0_182 = arith.constant 0 : index
    %228 = vector.load %arg11[%c0_180, %c0_181, %c0_182] : memref<1x1x128xf32, #tpu.memory_space<vmem>>, vector<1x1x128xf32>
    %229 = vector.shape_cast %228 : vector<1x1x128xf32> to vector<1x128xf32>
    %230 = vector.shape_cast %227 : vector<1x128xf32> to vector<1x1x128xf32>
    tpu.vector_store %arg11[%c0_180, %c0_181, %c0_182], %230 {strides = array<i32>} : memref<1x1x128xf32, #tpu.memory_space<vmem>>, vector<1x1x128xf32>,
    return
  }
  func.func @transform_0(%arg0: i32) -> (i32, i32, i32, i32) {
    %c0_i32 = arith.constant 0 : i32
    %c0_i32_0 = arith.constant 0 : i32
    %c0_i32_1 = arith.constant 0 : i32
    %c0_i32_2 = arith.constant 0 : i32
    return %arg0, %c0_i32, %c0_i32_0, %c0_i32_1 : i32, i32, i32, i32
  }
  func.func @transform_1(%arg0: i32) -> (i32, i32, i32) {
    %c0_i32 = arith.constant 0 : i32
    %c0_i32_0 = arith.constant 0 : i32
    %c0_i32_1 = arith.constant 0 : i32
    %c0_i32_2 = arith.constant 0 : i32
    return %c0_i32, %c0_i32_0, %c0_i32_1 : i32, i32, i32
  }
  func.func @transform_2(%arg0: i32) -> (i32, i32) {
    %c0_i32 = arith.constant 0 : i32
    %c0_i32_0 = arith.constant 0 : i32
    %c0_i32_1 = arith.constant 0 : i32
    return %c0_i32, %c0_i32_0 : i32, i32
  }
  func.func @transform_3(%arg0: i32) -> (i32, i32, i32) {
    %c0_i32 = arith.constant 0 : i32
    %c0_i32_0 = arith.constant 0 : i32
    %c0_i32_1 = arith.constant 0 : i32
    %c0_i32_2 = arith.constant 0 : i32
    return %c0_i32, %c0_i32_0, %c0_i32_1 : i32, i32, i32
  }
  func.func @transform_4(%arg0: i32) -> (i32, i32) {
    %c0_i32 = arith.constant 0 : i32
    %c0_i32_0 = arith.constant 0 : i32
    %c0_i32_1 = arith.constant 0 : i32
    return %c0_i32, %c0_i32_0 : i32, i32
  }
  func.func @transform_5(%arg0: i32) -> (i32, i32, i32) {
    %c0_i32 = arith.constant 0 : i32
    %c0_i32_0 = arith.constant 0 : i32
    %c0_i32_1 = arith.constant 0 : i32
    %c0_i32_2 = arith.constant 0 : i32
    return %c0_i32, %c0_i32_0, %c0_i32_1 : i32, i32, i32
  }
  func.func @transform_6(%arg0: i32) -> (i32, i32) {
    %c0_i32 = arith.constant 0 : i32
    %c0_i32_0 = arith.constant 0 : i32
    %c0_i32_1 = arith.constant 0 : i32
    return %c0_i32, %c0_i32_0 : i32, i32
  }
  func.func @transform_7(%arg0: i32) -> (i32, i32, i32) {
    %c0_i32 = arith.constant 0 : i32
    %c0_i32_0 = arith.constant 0 : i32
    %c0_i32_1 = arith.constant 0 : i32
    %c0_i32_2 = arith.constant 0 : i32
    return %c0_i32, %c0_i32_0, %c0_i32_1 : i32, i32, i32
  }
  func.func @transform_8(%arg0: i32) -> (i32, i32) {
    %c0_i32 = arith.constant 0 : i32
    %c0_i32_0 = arith.constant 0 : i32
    %c0_i32_1 = arith.constant 0 : i32
    return %c0_i32, %c0_i32_0 : i32, i32
  }
  func.func @transform_9(%arg0: i32) -> (i32, i32, i32) {
    %c0_i32 = arith.constant 0 : i32
    %c0_i32_0 = arith.constant 0 : i32
    %c0_i32_1 = arith.constant 0 : i32
    %c0_i32_2 = arith.constant 0 : i32
    return %c0_i32, %c0_i32_0, %c0_i32_1 : i32, i32, i32
  }
  func.func @transform_10(%arg0: i32) -> (i32, i32, i32) {
    %c0_i32 = arith.constant 0 : i32
    %c0_i32_0 = arith.constant 0 : i32
    %c0_i32_1 = arith.constant 0 : i32
    return %arg0, %c0_i32, %c0_i32_0 : i32, i32, i32
  }
}

</mosaic_0001>

<bundles_post_ra>
// kernel: encoder_forward.1
= control target key start
LH: loop header
LB: loop body
LE: loop exit
PB: predicated region body
PF: predicated region fallthrough
CT: control target
= control target key end

     0   :  { %15 = vsyncpa [#allocation7], 0  ;;  %s8048_s0 = inlined_call_operand.vmem [shape: f32[2,34,34,1], index: 0, kind: input, shape index: {}]   ;;  %s8049_s1 = inlined_call_operand.vmem [shape: f32[9,1,8], index: 1, kind: input, shape index: {}]   ;;  %s8050_s2 = inlined_call_operand.vmem [shape: f32[1,8], index: 2, kind: input, shape index: {}]   ;;  %s8051_s3 = inlined_call_operand.vmem [shape: f32[9,8,16], index: 3, kind: input, shape index: {}]   ;;  %s8052_s4 = inlined_call_operand.vmem [shape: f32[1,16], index: 4, kind: input, shape index: {}]   ;;  %s8053_s5 = inlined_call_operand.vmem [shape: f32[9,16,32], index: 5, kind: input, shape index: {}]   ;;  %s8054_s6 = inlined_call_operand.vmem [shape: f32[1,32], index: 6, kind: input, shape index: {}]   ;;  %s8055_s7 = inlined_call_operand.vmem [shape: f32[9,32,32], index: 7, kind: input, shape index: {}]   ;;  %s8056_s8 = inlined_call_operand.vmem [shape: f32[1,32], index: 8, kind: input, shape index: {}]   ;;  %s8057_s9 = inlined_call_operand.vmem [shape: f32[1,32,128], index: 9, kind: input, shape index: {}]   ;;  %s8058_s10 = inlined_call_operand.hbm [shape: f32[2,1,128], index: 10, kind: output, shape index: {}]  }
   0x1   :  { %17 = vsyncpa [#allocation7 + $0x1], 0  ;;  %s7082_s13 = smov 0   ;;  %s7084_s14 = smov 0  }
   0x2   :  { %s7086_s15 = smov 0   ;;  %s7088_s16 = smov 0  }
   0x3 LB: > { %s7103_s17 = sadd.s32 4294967295, %s7002_s16   ;;  %s5690_s18 = sadd.s32 4294967294, %s7002_s16   ;;  %s7002_s16 = sphi %s7088_s16, %s8066_s16   ;;  %s6998_s15 = sphi %s7086_s15, %s8065_s15   ;;  %s6994_s14 = sphi %s7084_s14, %s8064_s14   ;;  %s6990_s13 = sphi %s7082_s13, %s8063_s13  }
   0x4   : > { %s7107_s19 = sadd.s32 1, %s7002_s16   ;;  %s245_s20 = sadd.s32 1, %s6998_s15 }
   0x5   : > { %s242_s21 = ssub.s32 %s7002_s16, %s7107_s19  ;;  %p255_p0 = scmp.ne.s32.totalorder %s6998_s15, %s6994_s14 }
   0x6   : > { %p243_p1 = scmp.eq.s32.totalorder %s242_s21, 0  ;;  %p256_p2 = scmp.eq.s32.totalorder %s7103_s17, 1 }
   0x7   : > { %p261_p3 = scmp.ne.s32.totalorder %s6994_s14, %s6990_s13  ;;  %p262_p4 = scmp.eq.s32.totalorder %s5690_s18, 1 }
   0x8   : > { %s7118_s22 = scalar_select %p243_p1, %s6998_s15, %s245_s20  }
   0x9   : > { %p7120_p5 = por %p256_p2, %p255_p0  ;;  %p7124_p6 = por %p262_p4, %p261_p3 }
   0xa   : > { %p5693_p7 = scmp.ge.s32.totalorder %s7002_s16, 1  ;;  %p315_p8 = scmp.lt.s32.totalorder %s7002_s16, 3 }
   0xc   : > { %p316_p9 = pnand %p5693_p7, %p315_p8 }
   0xd   : > { %s8059_s25 = sand.u32 (!%p316_p9), 1, %s6994_s14   ;;  %p352_p10 = scmp.lt.s32.totalorder (!%p316_p9), %s7103_s17, 1  ;;  %v357_v0 = vlaneseq (!%p316_p9)  ;;  %v7135_v1 = vld [vmem:[%s8049_s1] ss:$0 sm:$0xff] (!%p316_p9)  ;;  %v7140_v2 = vld [vmem:[%s8049_s1 + $0x1] ss:$0 sm:$0xff] (!%p316_p9) }
   0xe   : > { %319 = sbr.rel (%p316_p9) target bundleno = 4028 (0xfbc), region = 60  ;;  %v7145_v3 = vld [vmem:[%s8049_s1 + $0x2] ss:$0 sm:$0xff] (!%p316_p9)  ;;  %v7151_v6 = vld [vmem:[%s8049_s1 + $0x3] ss:$0 sm:$0xff] (!%p316_p9)  ;;  %v7016_v18 = vmov (!%p316_p9), 0.0  }
   0xf   : > { %v358_v4 = vshrl.u32 (!%p316_p9), %v357_v0, 7  ;;  %v361_v5 = vand.u32 (!%p316_p9), 127, %v357_v0  ;;  %v7156_v7 = vld [vmem:[%s8049_s1 + $0x4] ss:$0 sm:$0xff] (!%p316_p9)  ;;  %v7161_v8 = vld [vmem:[%s8049_s1 + $0x5] ss:$0 sm:$0xff] (!%p316_p9) }
  0x10   : > { %v7166_v9 = vld [vmem:[%s8049_s1 + $0x6] ss:$0 sm:$0xff] (!%p316_p9)  ;;  %v7171_v12 = vld [vmem:[%s8049_s1 + $0x7] ss:$0 sm:$0xff] (!%p316_p9)  ;;  %v7176_v13 = vld [vmem:[%s8049_s1 + $0x8] ss:$0 sm:$0xff] (!%p316_p9) }
  0x11   : > { %v359_v10 = vadd.s32 (!%p316_p9), 8, %v358_v4  ;;  %v362_v11 = vmul.u32 (!%p316_p9), 2, %v358_v4  ;;  %v7181_v14 = vld [vmem:[%s8050_s2] ss:$0 sm:$0xff] (!%p316_p9)  ;;  %s7210_s18 = smov (!%p316_p9), 0  }
  0x13   : > { %v363_v15 = vmul.u32 (!%p316_p9), 2, %v359_v10  ;;  %vm364_vm0 = vcmp.eq.s32.totalorder (!%p316_p9), %v361_v5, %v362_v11  ;;  %v370_v16 = vadd.s32 (!%p316_p9), 1, %v362_v11  ;;  %v378_v17 = vadd.s32 (!%p316_p9), 2, %v362_v11 }
  0x14   : > { %v7189_v19 = vsel (!%p316_p9), %vm364_vm0, 1.0, %v7016_v18 }
  0x15   : > { %s353_s12 = scalar_select %p352_p10, %s7103_s17, 1  ;;  %vm365_vm1 = vcmp.eq.s32.totalorder %v361_v5, %v363_v15  ;;  %v371_v20 = vadd.s32 1, %v363_v15  ;;  %vm372_vm2 = vcmp.eq.s32.totalorder %v361_v5, %v370_v16  ;;  %v379_v21 = vadd.s32 2, %v363_v15 }
  0x16   : > { %v7192_v22 = vsel %vm365_vm1, 1.0, %v7016_v18  ;;  %v7195_v23 = vsel %vm372_vm2, 1.0, %v7016_v18  ;;  %vm380_vm3 = vcmp.eq.s32.totalorder %v361_v5, %v378_v17 }
  0x17   : > { %s6852_s11 = smul.u32 1360, %s353_s12  ;;  %vm373_vm4 = vcmp.eq.s32.totalorder %v361_v5, %v371_v20  ;;  %vm381_vm5 = vcmp.eq.s32.totalorder %v361_v5, %v379_v21  ;;  %v7198_v24 = vsel %vm380_vm3, 1.0, %v7016_v18 }
  0x18   : > { %v7201_v25 = vsel %vm373_vm4, 1.0, %v7016_v18  ;;  %v7204_v26 = vsel %vm381_vm5, 1.0, %v7016_v18 }
  0x19   : > { %s7186_s12 = scalar_lea.vmem %s8048_s0, %s6852_s11  ;;  %s7208_s11 = scalar_lea.vmem [#allocation6], %s8059_s25 }
  0x1a LB: >> { %v7017_v27 = vmov 0   ;;  %s5710_s20 = smul.u32 80, %s7006_s18  ;;  %vm465_vm6 = vcmask 277504   ;;  %vm472_vm7 = vcmask 1041408   ;;  %s5762_s26 = sshll.u32 %s7006_s18, 4  ;;  %vm1356_vm8 = vcmask 64512   ;;  %s7006_s18 = sphi %s7210_s18, %s409_s18  }
  0x1b   : >> { %6927 = vset.pattern.permute.xlu1 %v7017_v27  ;;  %6926 = vset.pattern.permute.xlu0 %v7017_v27  ;;  %s1355_s27 = scalar_lea.vmem [#allocation2], %s5762_s26  ;;  %s409_s18 = sadd.s32 1, %s7006_s18  }
  0x1c   : >> { %s7217_s21 = scalar_lea.vmem %s7186_s12, %s5710_s20  ;;  %6224 = vmatprep.mubr.msk.f32.mxu0 %vm465_vm6, %v7195_v23  ;;  %6172 = vmatprep.mubr.msk.f32.mxu1 %vm465_vm6, %v7195_v23  ;;  %p406_p11 = scmp.ge.s32.totalorder %s409_s18, 16  }
  0x1d   : >> { %v5727_v28 = vld [vmem:[%s7217_s21 + $0x38] sm:$0xff]  ;;  %v5725_v29 = vld [vmem:[%s7217_s21 + $0x28] sm:$0xff]  ;;  %v5728_v30 = vld [vmem:[%s7217_s21 + $0x40] sm:$0xff]  ;;  %s7461_s28 = smov (%p406_p11), 0  }
  0x1e   : >> { %752 = vperm.xlu1 %6927, %v5727_v28   ;;  %742 = vperm.xlu0 %6926, %v5725_v29   ;;  %v5726_v31 = vld [vmem:[%s7217_s21 + $0x30] sm:$0xff]  ;;  %v414_v32 = vld [vmem:[%s7217_s21 + $0x8] sm:$0xff]  ;;  %v413_v33 = vld [vmem:[%s7217_s21] sm:$0xff] }
  0x1f   : >> { %v415_v34 = vld [vmem:[%s7217_s21 + $0x10] sm:$0xff]  ;;  %v5729_v35 = vld [vmem:[%s7217_s21 + $0x48] sm:$0x3]  ;;  %v417_v36 = vld [vmem:[%s7217_s21 + $0x20] sm:$0x3] }
  0x20   : >> { %v416_v37 = vld [vmem:[%s7217_s21 + $0x18] sm:$0xff]  ;;  %v5744_v39 = vld [vmem:[%s7217_s21 + $0x50] sm:$0xff]  ;;  %v5747_v40 = vld [vmem:[%s7217_s21 + $0x68] sm:$0xff] }
  0x21   : >> { %v5745_v38 = vld [vmem:[%s7217_s21 + $0x58] sm:$0xff]  ;;  %v5746_v41 = vld [vmem:[%s7217_s21 + $0x60] sm:$0xff]  ;;  %v5748_v42 = vld [vmem:[%s7217_s21 + $0x70] sm:$0x3] }
  0x22   : >> { %757 = vperm.xlu1 %6927, %v5728_v30   ;;  %747 = vperm.xlu0 %6926, %v5726_v31  }
  0x26   : >> { %425 = vperm.xlu1 %6927, %v414_v32   ;;  %420 = vperm.xlu0 %6926, %v413_v33  }
  0x2a   : >> { %430 = vperm.xlu1 %6927, %v415_v34   ;;  %762 = vperm.xlu0 %6926, %v5729_v35  }
  0x2e   : >> { %440 = vperm.xlu1 %6927, %v417_v36   ;;  %435 = vperm.xlu0 %6926, %v416_v37  }
  0x32   : >> { %1053 = vperm.xlu1 %6927, %v5745_v38   ;;  %1048 = vperm.xlu0 %6926, %v5744_v39  }
  0x36   : >> { %1063 = vperm.xlu1 %6927, %v5747_v40   ;;  %1058 = vperm.xlu0 %6926, %v5746_v41  }
  0x3a   : >> { %1068 = vperm.xlu0 %6926, %v5748_v42  }
  0x9d   : >> { %v7238_v43 = vpop.permute.xlu1 %752  ;;  %v7240_v44 = vpop.permute.xlu0 %742 }
  0x9e   : >> { %v864_v47 = vmul.f32 %v7156_v7, %v7238_v43  ;;  %v862_v49 = vmul.f32 %v7156_v7, %v7240_v44  ;;  %v955_v62 = vmul.f32 %v7161_v8, %v7238_v43  ;;  %v953_v63 = vmul.f32 %v7161_v8, %v7240_v44 }
  0xa1   : >> { %v7242_v45 = vpop.permute.xlu1 %757  ;;  %v7244_v46 = vpop.permute.xlu0 %747 }
  0xa2   : >> { %v865_v48 = vmul.f32 %v7156_v7, %v7242_v45  ;;  %v863_v50 = vmul.f32 %v7156_v7, %v7244_v46  ;;  %v954_v60 = vmul.f32 %v7161_v8, %v7244_v46  ;;  %v956_v0 = vmul.f32 %v7161_v8, %v7242_v45 }
  0xa4   : >> { %v6682_v53 = vpack.c.bf16 %v863_v50, %v862_v49  ;;  %v6686_v54 = vpack.c.bf16 %v865_v48, %v864_v47  ;;  %v6690_v15 = vpack.c.bf16 %v954_v60, %v953_v63  ;;  %v6694_v21 = vpack.c.bf16 %v956_v0, %v955_v62 }
  0xa5   : >> { %v7254_v51 = vpop.permute.xlu1 %425  ;;  %v7256_v52 = vpop.permute.xlu0 %420  ;;  %v772_v63 = vmul.f32 %v7151_v6, %v7244_v46 }
  0xa6   : >> { %6683 = vmatprep.subr.bf16.mxu0 %v6682_v53  ;;  %v460_v55 = vmul.f32 %v7140_v2, %v7256_v52  ;;  %v461_v56 = vmul.f32 %v7140_v2, %v7254_v51  ;;  %v450_v27 = vmul.f32 %v7135_v1, %v7254_v51  ;;  %v449_v28 = vmul.f32 %v7135_v1, %v7256_v52 }
  0xa7   : >> { %6685 = vmatpush3.bf16.msra.mxu0 %v6682_v53  ;;  %v642_v47 = vmul.f32 %v7145_v3, %v7254_v51  ;;  %v641_v48 = vmul.f32 %v7145_v3, %v7256_v52 }
  0xa8   : >> { %6687 = vmatprep.subr.bf16.mxu0 %v6686_v54  ;;  %v6650_v59 = vpack.c.bf16 %v461_v56, %v460_v55  ;;  %v6658_v37 = vpack.c.bf16 %v450_v27, %v449_v28 }
  0xa9   : >> { %v7262_v57 = vpop.permute.xlu1 %430  ;;  %v7264_v58 = vpop.permute.xlu0 %762  ;;  %v6666_v56 = vpack.c.bf16 %v642_v47, %v641_v48 }
  0xaa   : >> { %v866_v61 = vmul.f32 %v7156_v7, %v7264_v58  ;;  %6651 = vmatprep.subr.bf16.mxu1 %v6650_v59  ;;  %v462_v10 = vmul.f32 %v7140_v2, %v7262_v57  ;;  %v957_v30 = vmul.f32 %v7161_v8, %v7264_v58  ;;  %v451_v36 = vmul.f32 %v7135_v1, %v7262_v57  ;;  %v7454_v7 = vld [vmem:[%s8051_s3 + $0x40] sm:$0xff] (%p406_p11) }
  0xab   : >> { %6653 = vmatpush3.bf16.msra.mxu1 %v6650_v59  ;;  %6689 = vmatpush3.bf16.msra.mxu0 %v6686_v54  ;;  %v643_v55 = vmul.f32 %v7145_v3, %v7262_v57  ;;  %v7459_v8 = vld [vmem:[%s8052_s4] ss:$0 sm:$0xff] (%p406_p11) }
  0xac   : >> { %6222 = vmatprep.subr.msk.mxu0 %vm472_vm7, %v866_v61 }
  0xad   : >> { %v7277_v4 = vpop.permute.xlu1 %440  ;;  %v436_v5 = vpop.permute.xlu0 %435 }
  0xae   : >> { %v463_v11 = vmul.f32 %v7140_v2, %v436_v5  ;;  %v464_v29 = vmul.f32 %v7140_v2, %v7277_v4  ;;  %v452_v31 = vmul.f32 %v7135_v1, %v436_v5  ;;  %v453_v49 = vmul.f32 %v7135_v1, %v7277_v4  ;;  %v7434_v1 = vld [vmem:[%s8051_s3 + $0x20] sm:$0xff] (%p406_p11)  ;;  %v7439_v2 = vld [vmem:[%s8051_s3 + $0x28] sm:$0xff] (%p406_p11) }
  0xaf   : >> { %6223 = vmatpush3.msk.msra.mxu0 %vm472_vm7, %v866_v61  ;;  %v644_v53 = vmul.f32 %v7145_v3, %v436_v5  ;;  %v645_v0 = vmul.f32 %v7145_v3, %v7277_v4  ;;  %v773_v5 = vmul.f32 %v7151_v6, %v7238_v43  ;;  %v7444_v3 = vld [vmem:[%s8051_s3 + $0x30] sm:$0xff] (%p406_p11) }
  0xb0   : >> { %6691 = vmatprep.subr.bf16.mxu0 %v6690_v15  ;;  %6225 = vmatmul.mubr.msk.f32.vlgmr.msra.gmra.mrb[0].mxu0 %vm465_vm6, %v7201_v25  ;;  %v6654_v20 = vpack.c.bf16 %v463_v11, %v462_v10  ;;  %v6662_v40 = vpack.c.bf16 %v452_v31, %v451_v36  ;;  %v771_v10 = vmul.f32 %v7151_v6, %v7240_v44 }
  0xb1   : >> { %v7283_v16 = vpop.permute.xlu1 %1053  ;;  %v7287_v17 = vpop.permute.xlu0 %1048  ;;  %6693 = vmatpush3.bf16.msra.mxu0 %v6690_v15  ;;  %6237 = vmatprep.mubr.msk.f32.mxu0 %vm465_vm6, %v7198_v24  ;;  %v6670_v61 = vpack.c.bf16 %v644_v53, %v643_v55  ;;  %v774_v11 = vmul.f32 %v7151_v6, %v7242_v45 }
  0xb2   : >> { %6655 = vmatprep.subr.bf16.mxu1 %v6654_v20  ;;  %6695 = vmatprep.subr.bf16.mxu0 %v6694_v21  ;;  %v1078_v32 = vmul.f32 %v7166_v9, %v7283_v16  ;;  %v1077_v33 = vmul.f32 %v7166_v9, %v7287_v17  ;;  %v1169_v51 = vmul.f32 %v7171_v12, %v7283_v16 }
  0xb3   : >> { %6657 = vmatpush3.bf16.msra.mxu1 %v6654_v20  ;;  %v1168_v52 = vmul.f32 %v7171_v12, %v7287_v17  ;;  %v1260_v46 = vmul.f32 %v7176_v13, %v7283_v16  ;;  %v1259_v4 = vmul.f32 %v7176_v13, %v7287_v17  ;;  %v6674_v20 = vpack.c.bf16 %v772_v63, %v771_v10 }
  0xb4   : >> { %6170 = vmatprep.subr.msk.mxu1 %vm472_vm7, %v464_v29  ;;  %v6698_v41 = vpack.c.bf16 %v1078_v32, %v1077_v33  ;;  %v6678_v45 = vpack.c.bf16 %v774_v11, %v773_v5 }
  0xb5   : >> { %v7305_v34 = vpop.permute.xlu1 %1063  ;;  %v7307_v35 = vpop.permute.xlu0 %1058  ;;  %6697 = vmatpush3.bf16.msra.mxu0 %v6694_v21  ;;  %v6706_v62 = vpack.c.bf16 %v1169_v51, %v1168_v52  ;;  %v6714_v16 = vpack.c.bf16 %v1260_v46, %v1259_v4  ;;  %v775_v21 = vmul.f32 %v7151_v6, %v7264_v58  ;;  %v7449_v6 = vld [vmem:[%s8051_s3 + $0x38] sm:$0xff] (%p406_p11) }
  0xb6   : >> { %6235 = vmatprep.subr.msk.mxu0 %vm472_vm7, %v957_v30  ;;  %v1080_v38 = vmul.f32 %v7166_v9, %v7305_v34  ;;  %v1079_v39 = vmul.f32 %v7166_v9, %v7307_v35  ;;  %v1171_v59 = vmul.f32 %v7171_v12, %v7305_v34  ;;  %v1170_v60 = vmul.f32 %v7171_v12, %v7307_v35 }
  0xb7   : >> { %6171 = vmatpush3.msk.msra.mxu1 %vm472_vm7, %v464_v29  ;;  %v1262_v43 = vmul.f32 %v7176_v13, %v7305_v34  ;;  %v1261_v44 = vmul.f32 %v7176_v13, %v7307_v35 }
  0xb8   : >> { %6659 = vmatprep.subr.bf16.mxu1 %v6658_v37  ;;  %6173 = vmatmul.mubr.msk.f32.vlgmr.msra.gmra.mrb[0].mxu1 %vm465_vm6, %v7201_v25  ;;  %v6702_v42 = vpack.c.bf16 %v1080_v38, %v1079_v39  ;;  %v6710_v57 = vpack.c.bf16 %v1171_v59, %v1170_v60  ;;  %v7419_v38 = vld [vmem:[%s8051_s3 + $0x8] sm:$0xff] (%p406_p11)  ;;  %v7424_v39 = vld [vmem:[%s8051_s3 + $0x10] sm:$0xff] (%p406_p11) }
  0xb9   : >> { %6661 = vmatpush3.bf16.msra.mxu1 %v6658_v37  ;;  %6236 = vmatpush3.msk.msra.mxu0 %vm472_vm7, %v957_v30  ;;  %v7330_v50 = vpop.permute.xlu0 %1068  ;;  %v6718_v17 = vpack.c.bf16 %v1262_v43, %v1261_v44  ;;  %v7414_v37 = vld [vmem:[%s8051_s3] sm:$0xff] (%p406_p11) }
  0xba   : >> { %6663 = vmatprep.subr.bf16.mxu1 %v6662_v40  ;;  %6699 = vmatprep.subr.bf16.mxu0 %v6698_v41  ;;  %v1081_v54 = vmul.f32 %v7166_v9, %v7330_v50  ;;  %v1172_v15 = vmul.f32 %v7171_v12, %v7330_v50  ;;  %v1263_v27 = vmul.f32 %v7176_v13, %v7330_v50 }
  0xbb   : >> { %6238 = vmatmul.mubr.msk.f32.vlgmr.msra.gmra.mrb[0].mxu0 %vm465_vm6, %v7204_v26  ;;  %6185 = vmatprep.mubr.msk.f32.mxu1 %vm465_vm6, %v7189_v19 }
  0xbc   : >> { %6701 = vmatpush3.bf16.msra.mxu0 %v6698_v41  ;;  %6250 = vmatprep.mubr.msk.f32.mxu0 %vm465_vm6, %v7189_v19 }
  0xbd   : >> { %6703 = vmatprep.subr.bf16.mxu0 %v6702_v42  ;;  %6665 = vmatpush3.bf16.msra.mxu1 %v6662_v40  ;;  %v7429_v40 = vld [vmem:[%s8051_s3 + $0x18] sm:$0xff] (%p406_p11) }
  0xbe   : >> { %6183 = vmatprep.subr.msk.mxu1 %vm472_vm7, %v453_v49 }
  0xc0   : >> { %6705 = vmatpush3.bf16.msra.mxu0 %v6702_v42 }
  0xc1   : >> { %6248 = vmatprep.subr.msk.mxu0 %vm472_vm7, %v1081_v54  ;;  %6184 = vmatpush3.msk.msra.mxu1 %vm472_vm7, %v453_v49 }
  0xc2   : >> { %6667 = vmatprep.subr.bf16.mxu1 %v6666_v56  ;;  %6186 = vmatmul.mubr.msk.f32.vlgmr.msra.gmra.mrb[0].mxu1 %vm465_vm6, %v7192_v22 }
  0xc3   : >> { %6669 = vmatpush3.bf16.msra.mxu1 %v6666_v56  ;;  %6198 = vmatprep.mubr.msk.f32.mxu1 %vm465_vm6, %v7198_v24 }
  0xc4   : >> { %6249 = vmatpush3.msk.msra.mxu0 %vm472_vm7, %v1081_v54  ;;  %6671 = vmatprep.subr.bf16.mxu1 %v6670_v61 }
  0xc5   : >> { %6707 = vmatprep.subr.bf16.mxu0 %v6706_v62  ;;  %6251 = vmatmul.mubr.msk.f32.vlgmr.msra.gmra.mrb[0].mxu0 %vm465_vm6, %v7192_v22 }
  0xc6   : >> { %6709 = vmatpush3.bf16.msra.mxu0 %v6706_v62  ;;  %6263 = vmatprep.mubr.msk.f32.mxu0 %vm465_vm6, %v7195_v23 }
  0xc7   : >> { %6711 = vmatprep.subr.bf16.mxu0 %v6710_v57  ;;  %6673 = vmatpush3.bf16.msra.mxu1 %v6670_v61 }
  0xc8   : >> { %6196 = vmatprep.subr.msk.mxu1 %vm472_vm7, %v645_v0 }
  0xca   : >> { %6713 = vmatpush3.bf16.msra.mxu0 %v6710_v57 }
  0xcb   : >> { %6261 = vmatprep.subr.msk.mxu0 %vm472_vm7, %v1172_v15  ;;  %6197 = vmatpush3.msk.msra.mxu1 %vm472_vm7, %v645_v0 }
  0xcc   : >> { %6675 = vmatprep.subr.bf16.mxu1 %v6674_v20  ;;  %6199 = vmatmul.mubr.msk.f32.vlgmr.msra.gmra.mrb[0].mxu1 %vm465_vm6, %v7204_v26 }
  0xcd   : >> { %6677 = vmatpush3.bf16.msra.mxu1 %v6674_v20  ;;  %6211 = vmatprep.mubr.msk.f32.mxu1 %vm465_vm6, %v7189_v19 }
  0xce   : >> { %6262 = vmatpush3.msk.msra.mxu0 %vm472_vm7, %v1172_v15  ;;  %6679 = vmatprep.subr.bf16.mxu1 %v6678_v45 }
  0xcf   : >> { %6715 = vmatprep.subr.bf16.mxu0 %v6714_v16  ;;  %6264 = vmatmul.mubr.msk.f32.vlgmr.msra.gmra.mrb[0].mxu0 %vm465_vm6, %v7201_v25 }
  0xd0   : >> { %6717 = vmatpush3.bf16.msra.mxu0 %v6714_v16  ;;  %6276 = vmatprep.mubr.msk.f32.mxu0 %vm465_vm6, %v7198_v24 }
  0xd1   : >> { %6719 = vmatprep.subr.bf16.mxu0 %v6718_v17  ;;  %6681 = vmatpush3.bf16.msra.mxu1 %v6678_v45 }
  0xd2   : >> { %6209 = vmatprep.subr.msk.mxu1 %vm472_vm7, %v775_v21 }
  0xd4   : >> { %6721 = vmatpush3.bf16.msra.mxu0 %v6718_v17 }
  0xd5   : >> { %6274 = vmatprep.subr.msk.mxu0 %vm472_vm7, %v1263_v27  ;;  %6210 = vmatpush3.msk.msra.mxu1 %vm472_vm7, %v775_v21 }
  0xd6   : >> { %6212 = vmatmul.mubr.msk.f32.vlgmr.msra.gmra.mrb[0].mxu1 %vm465_vm6, %v7192_v22 }
  0xd8   : >> { %6275 = vmatpush3.msk.msra.mxu0 %vm472_vm7, %v1263_v27 }
  0xd9   : >> { %6277 = vmatmul.mubr.msk.f32.vlgmr.msra.gmra.mrb[0].mxu0 %vm465_vm6, %v7204_v26 }
 0x1a9   : >> { %v6213_v58 = vpop.f32.mrb[0].mxu1 }
 0x1aa   : >> { %v845_v28 = vpop.f32.mrb[1].mxu1 }
 0x1ac   : >> { %v6278_v29 = vpop.f32.mrb[0].mxu0 }
 0x1ad   : >> { %v6836_v30 = vadd.f32 %v6278_v29, %v6213_v58  ;;  %v1333_v31 = vpop.f32.mrb[1].mxu0 }
 0x1ae   : >> { %v6837_v32 = vadd.f32 %v1333_v31, %v845_v28  ;;  %408 = sbr.rel (!%p406_p11) target bundleno = 26 (0x1a), region = 162 }
 0x1af   : >> { %v1351_v33 = vadd.f32 %v6836_v30, %v7181_v14 }
 0x1b0   : >> { %v1350_v34 = vadd.f32 %v6837_v32, %v7181_v14 }
 0x1b1   : >> { %v1353_v35 = vmax.f32 %v1351_v33, 0.0 }
 0x1b2   : >> { %v1352_v36 = vmax.f32 %v1350_v34, 0.0 }
 0x1b3   : >> { %1358 = vst.msk [vmem:[%s1355_s27 + $0x8] sm:$0xff] %vm1356_vm8, %v1353_v35 }
 0x1b4   : >> { %1357 = vst.msk [vmem:[%s1355_s27] sm:$0xff] %vm1356_vm8, %v1352_v36 }
 0x1b5 LB: >> { %6279 = vmatprep.subr.mxu0 %v7414_v37  ;;  %6284 = vmatprep.subr.mxu1 %v7419_v38  ;;  %s5926_s29 = sshll.u32 %s7010_s28, 5  ;;  %v7018_v13 = vmov 0.0|0.0   ;;  %vm7019_vm9 = vmmov 0   ;;  %v7020_v14 = vmov 0.0   ;;  %vm1545_vm10 = vcmask 130048   ;;  %s5809_s20 = sshll.u32 %s7010_s28, 3  ;;  %s7010_s28 = sphi %s7461_s28, %s1382_s28  }
 0x1b6   : >> { %6280 = vmatpush3.msra.mxu0 %v7414_v37  ;;  %6285 = vmatpush3.msra.mxu1 %v7419_v38  ;;  %s7471_s30 = scalar_lea.vmem [#allocation2], %s5926_s29  ;;  %vm2749_vm11 = vcmask 129024   ;;  %s2748_s21 = scalar_lea.vmem [#allocation3], %s5809_s20 }
 0x1b7   : >> { %6722 = vmatprep.subr.bf16.mxu0 %v7018_v13  ;;  %6725 = vmatprep.subr.bf16.mxu1 %v7018_v13  ;;  %s1382_s28 = sadd.s32 1, %s7010_s28  }
 0x1b8   : >> { %p1379_p12 = scmp.ge.s32.totalorder %s1382_s28, 7  }
 0x1b9   : > { %v7584_v37 = vld [vmem:[%s8053_s5 + $0x20] sm:$0xff] (%p1379_p12)  ;;  %v7589_v38 = vld [vmem:[%s8053_s5 + $0x28] sm:$0xff] (%p1379_p12)  ;;  %s7656_s28 = smov (%p1379_p12), 0  }
 0x1bb   : >> { %v1386_v9 = vld [vmem:[%s7471_s30] sm:$0xff]  ;;  %v1387_v12 = vld [vmem:[%s7471_s30 + $0x8] sm:$0xff]  ;;  %v5784_v48 = vld [vmem:[%s7471_s30 + $0x10] sm:$0xff] }
 0x1bc   : >> { %6281 = vmatprep.mubr.msk.f32.mxu0 %vm1356_vm8, %v1386_v9  ;;  %6286 = vmatprep.mubr.msk.f32.mxu1 %vm1356_vm8, %v1386_v9  ;;  %v5785_v49 = vld [vmem:[%s7471_s30 + $0x18] sm:$0xff]  ;;  %v5797_v50 = vld [vmem:[%s7471_s30 + $0x20] sm:$0xff]  ;;  %v5798_v53 = vld [vmem:[%s7471_s30 + $0x28] sm:$0xff] }
 0x1bd   : >> { %6282 = vmatmul.mubr.msk.f32.vlgmr.msra.gmra.mrb[0].mxu0 %vm1356_vm8, %v1387_v12  ;;  %6287 = vmatmul.mubr.msk.f32.vlgmr.msra.gmra.mrb[0].mxu1 %vm1356_vm8, %v1387_v12 }
 0x1be   : >> { %6293 = vmatprep.mubr.msk.f32.mxu0 %vm7019_vm9, %v7020_v14  ;;  %6300 = vmatprep.mubr.msk.f32.mxu1 %vm7019_vm9, %v7020_v14 }
 0x290   : >> { %v6283_v22 = vpop.f32.mrb[0].mxu0  ;;  %v6288_v25 = vpop.f32.mrb[0].mxu1 }
 0x291   : >> { %v1461_v26 = vpop.f32.mrb[1].mxu0  ;;  %v1536_v41 = vpop.f32.mrb[1].mxu1 }
 0x292   : >> { %v6726_v42 = vpack.c.bf16 %v6283_v22, %v1461_v26  ;;  %v6723_v47 = vpack.c.bf16 %v6288_v25, %v1536_v41 }
 0x294   : >> { %6724 = vmatpush3.bf16.msra.mxu0 %v6723_v47  ;;  %6727 = vmatpush3.bf16.msra.mxu1 %v6726_v42 }
 0x295   : >> { %6303 = vmatprep.subr.mxu0 %v7424_v39  ;;  %6728 = vmatprep.subr.bf16.mxu1 %v7018_v13 }
 0x297   : >> { %6294 = vmatmul.mubr.msk.f32.vlgmr.msra.gmra.mrb[2].mxu0 %vm1545_vm10, %v7195_v23  ;;  %6301 = vmatmul.mubr.msk.f32.vlgmr.msra.gmra.mrb[2].mxu1 %vm1545_vm10, %v7189_v19 }
 0x298   : >> { %6304 = vmatpush3.msra.mxu0 %v7424_v39  ;;  %6305 = vmatprep.mubr.msk.f32.mxu0 %vm1356_vm8, %v1386_v9  ;;  %v7594_v39 = vld [vmem:[%s8053_s5 + $0x30] sm:$0xff] (%p1379_p12) }
 0x299   : >> { %6315 = vmatprep.subr.mxu0 %v7429_v40  ;;  %6312 = vmatprep.mubr.msk.f32.mxu1 %vm7019_vm9, %v7020_v14 }
 0x29b   : >> { %6306 = vmatmul.mubr.msk.f32.vlgmr.msra.gmra.mrb[4].mxu0 %vm1356_vm8, %v1387_v12 }
 0x29c   : >> { %6316 = vmatpush3.msra.mxu0 %v7429_v40  ;;  %6317 = vmatprep.mubr.msk.f32.mxu0 %vm1356_vm8, %v5784_v48  ;;  %v7599_v40 = vld [vmem:[%s8053_s5 + $0x38] sm:$0xff] (%p1379_p12) }
 0x29d   : >> { %6327 = vmatprep.subr.mxu0 %v7434_v1 }
 0x29f   : >> { %6318 = vmatmul.mubr.msk.f32.vlgmr.msra.gmra.mrb[6].mxu0 %vm1356_vm8, %v5785_v49 }
 0x2a0   : >> { %6328 = vmatpush3.msra.mxu0 %v7434_v1  ;;  %6329 = vmatprep.mubr.msk.f32.mxu0 %vm1356_vm8, %v5784_v48  ;;  %v7604_v1 = vld [vmem:[%s8053_s5 + $0x40] sm:$0xff] (%p1379_p12) }
 0x2a1   : >> { %6339 = vmatprep.subr.mxu0 %v7439_v2 }
 0x2a3   : >> { %6330 = vmatmul.mubr.msk.f32.vlgmr.msra.gmra.mrb[8].mxu0 %vm1356_vm8, %v5785_v49 }
 0x2a4   : >> { %6340 = vmatpush3.msra.mxu0 %v7439_v2  ;;  %6341 = vmatprep.mubr.msk.f32.mxu0 %vm1356_vm8, %v5784_v48  ;;  %v7609_v2 = vld [vmem:[%s8053_s5 + $0x48] sm:$0xff] (%p1379_p12) }
 0x2a5   : >> { %6351 = vmatprep.subr.mxu0 %v7444_v3 }
 0x2a7   : >> { %6342 = vmatmul.mubr.msk.f32.vlgmr.msra.gmra.mrb[10].mxu0 %vm1356_vm8, %v5785_v49 }
 0x2a8   : >> { %6352 = vmatpush3.msra.mxu0 %v7444_v3  ;;  %6353 = vmatprep.mubr.msk.f32.mxu0 %vm1356_vm8, %v5797_v50  ;;  %v7614_v3 = vld [vmem:[%s8053_s5 + $0x50] sm:$0xff] (%p1379_p12) }
 0x2a9   : >> { %6363 = vmatprep.subr.mxu0 %v7449_v6 }
 0x2ab   : >> { %6354 = vmatmul.mubr.msk.f32.vlgmr.msra.gmra.mrb[12].mxu0 %vm1356_vm8, %v5798_v53 }
 0x2ac   : >> { %6364 = vmatpush3.msra.mxu0 %v7449_v6  ;;  %6365 = vmatprep.mubr.msk.f32.mxu0 %vm1356_vm8, %v5797_v50  ;;  %v7619_v6 = vld [vmem:[%s8053_s5 + $0x58] sm:$0xff] (%p1379_p12) }
 0x2ad   : >> { %6375 = vmatprep.subr.mxu0 %v7454_v7 }
 0x2af   : >> { %6366 = vmatmul.mubr.msk.f32.vlgmr.msra.gmra.mrb[14].mxu0 %vm1356_vm8, %v5798_v53 }
 0x2b0   : >> { %6376 = vmatpush3.msra.mxu0 %v7454_v7  ;;  %6377 = vmatprep.mubr.msk.f32.mxu0 %vm1356_vm8, %v5797_v50  ;;  %v7624_v7 = vld [vmem:[%s8053_s5 + $0x60] sm:$0xff] (%p1379_p12) }
 0x2b3   : >> { %6378 = vmatmul.mubr.msk.f32.vlgmr.msra.gmra.mrb[16].mxu0 %vm1356_vm8, %v5798_v53  ;;  %v7564_v53 = vld [vmem:[%s8053_s5] sm:$0xff] (%p1379_p12) }
 0x36a   : >> { %v1615_v51 = vpop.f32.mrb[2].mxu0  ;;  %v1688_v52 = vpop.f32.mrb[2].mxu1 }
 0x36b   : >> { %v1689_v54 = vadd.f32 %v1688_v52, %v1615_v51  ;;  %v6295_v55 = vpop.f32.mrb[3].mxu0  ;;  %v6302_v56 = vpop.f32.mrb[3].mxu1  ;;  %v7569_v51 = vld [vmem:[%s8053_s5 + $0x8] sm:$0xff] (%p1379_p12)  ;;  %v7574_v52 = vld [vmem:[%s8053_s5 + $0x10] sm:$0xff] (%p1379_p12) }
 0x36c   : > { %v7634_v55 = vld [vmem:[%s8053_s5 + $0x70] sm:$0xff] (%p1379_p12)  ;;  %v7639_v56 = vld [vmem:[%s8053_s5 + $0x78] sm:$0xff] (%p1379_p12) }
 0x36e   : >> { %v6307_v59 = vpop.f32.mrb[4].mxu0 }
 0x36f   : >> { %v1758_v60 = vpop.f32.mrb[5].mxu0 }
 0x370   : >> { %v6729_v61 = vpack.c.bf16 %v6307_v59, %v1758_v60  ;;  %v7644_v59 = vld [vmem:[%s8053_s5 + $0x80] sm:$0xff] (%p1379_p12)  ;;  %v7649_v60 = vld [vmem:[%s8053_s5 + $0x88] sm:$0xff] (%p1379_p12) }
 0x372   : >> { %6730 = vmatpush3.bf16.msra.mxu1 %v6729_v61  ;;  %v6319_v62 = vpop.f32.mrb[6].mxu0  ;;  %v7654_v61 = vld [vmem:[%s8054_s6] ss:$0 sm:$0xff] (%p1379_p12) }
 0x373   : >> { %v1918_v57 = vpop.f32.mrb[7].mxu0  ;;  %6731 = vmatprep.subr.bf16.mxu1 %v7018_v13 }
 0x374   : >> { %v6732_v63 = vpack.c.bf16 %v6319_v62, %v1918_v57 }
 0x375   : >> { %6313 = vmatmul.mubr.msk.f32.vlgmr.msra.gmra.mrb[4].mxu1 %vm1545_vm10, %v7198_v24 }
 0x376   : >> { %6733 = vmatpush3.bf16.msra.mxu1 %v6732_v63  ;;  %v6331_v0 = vpop.f32.mrb[8].mxu0  ;;  %6324 = vmatprep.mubr.msk.f32.mxu1 %vm7019_vm9, %v7020_v14 }
 0x377   : >> { %v2064_v5 = vpop.f32.mrb[9].mxu0  ;;  %6734 = vmatprep.subr.bf16.mxu1 %v7018_v13 }
 0x378   : >> { %v6735_v10 = vpack.c.bf16 %v6331_v0, %v2064_v5 }
 0x379   : >> { %6325 = vmatmul.mubr.msk.f32.vlgmr.msra.gmra.mrb[6].mxu1 %vm1545_vm10, %v7189_v19 }
 0x37a   : >> { %6736 = vmatpush3.bf16.msra.mxu1 %v6735_v10  ;;  %v6343_v11 = vpop.f32.mrb[10].mxu0  ;;  %6336 = vmatprep.mubr.msk.f32.mxu1 %vm7019_vm9, %v7020_v14 }
 0x37b   : >> { %v2210_v46 = vpop.f32.mrb[11].mxu0  ;;  %6737 = vmatprep.subr.bf16.mxu1 %v7018_v13 }
 0x37c   : >> { %v6738_v4 = vpack.c.bf16 %v6343_v11, %v2210_v46 }
 0x37d   : >> { %6337 = vmatmul.mubr.msk.f32.vlgmr.msra.gmra.mrb[8].mxu1 %vm1545_vm10, %v7195_v23 }
 0x37e   : >> { %6739 = vmatpush3.bf16.msra.mxu1 %v6738_v4  ;;  %v6355_v15 = vpop.f32.mrb[12].mxu0  ;;  %6348 = vmatprep.mubr.msk.f32.mxu1 %vm7019_vm9, %v7020_v14 }
 0x37f   : >> { %v2367_v20 = vpop.f32.mrb[13].mxu0  ;;  %6740 = vmatprep.subr.bf16.mxu1 %v7018_v13 }
 0x380   : >> { %v6741_v43 = vpack.c.bf16 %v6355_v15, %v2367_v20 }
 0x381   : >> { %6349 = vmatmul.mubr.msk.f32.vlgmr.msra.gmra.mrb[10].mxu1 %vm1545_vm10, %v7198_v24 }
 0x382   : >> { %6742 = vmatpush3.bf16.msra.mxu1 %v6741_v43  ;;  %v6367_v44 = vpop.f32.mrb[14].mxu0  ;;  %6360 = vmatprep.mubr.msk.f32.mxu1 %vm7019_vm9, %v7020_v14 }
 0x383   : >> { %v2513_v45 = vpop.f32.mrb[15].mxu0  ;;  %6743 = vmatprep.subr.bf16.mxu1 %v7018_v13 }
 0x384   : >> { %v6744_v16 = vpack.c.bf16 %v6367_v44, %v2513_v45 }
 0x385   : >> { %6361 = vmatmul.mubr.msk.f32.vlgmr.msra.gmra.mrb[12].mxu1 %vm1545_vm10, %v7189_v19 }
 0x386   : >> { %6745 = vmatpush3.bf16.msra.mxu1 %v6744_v16  ;;  %v6379_v17 = vpop.f32.mrb[16].mxu0  ;;  %6372 = vmatprep.mubr.msk.f32.mxu1 %vm7019_vm9, %v7020_v14 }
 0x387   : >> { %v2659_v21 = vpop.f32.mrb[17].mxu0  ;;  %6746 = vmatprep.subr.bf16.mxu1 %v7018_v13 }
 0x388   : >> { %v6747_v27 = vpack.c.bf16 %v6379_v17, %v2659_v21 }
 0x389   : >> { %6373 = vmatmul.mubr.msk.f32.vlgmr.msra.gmra.mrb[14].mxu1 %vm1545_vm10, %v7195_v23 }
 0x38a   : >> { %6748 = vmatpush3.bf16.msra.mxu1 %v6747_v27  ;;  %6384 = vmatprep.mubr.msk.f32.mxu1 %vm7019_vm9, %v7020_v14 }
 0x38d   : >> { %6385 = vmatmul.mubr.msk.f32.vlgmr.msra.gmra.mrb[16].mxu1 %vm1545_vm10, %v7198_v24 }
 0x448   : >> { %v1836_v58 = vpop.f32.mrb[4].mxu1 }
 0x449   : >> { %v1840_v28 = vadd.f32 %v1836_v58, %v1689_v54  ;;  %v6314_v29 = vpop.f32.mrb[5].mxu1  ;;  %v7579_v54 = vld [vmem:[%s8053_s5 + $0x18] sm:$0xff] (%p1379_p12) }
 0x44c   : >> { %v1993_v30 = vpop.f32.mrb[6].mxu1 }
 0x44d   : >> { %v1997_v31 = vadd.f32 %v1993_v30, %v1840_v28  ;;  %v6326_v32 = vpop.f32.mrb[7].mxu1 }
 0x450   : >> { %v2139_v33 = vpop.f32.mrb[8].mxu1 }
 0x451   : >> { %v2143_v34 = vadd.f32 %v2139_v33, %v1997_v31  ;;  %v6338_v35 = vpop.f32.mrb[9].mxu1 }
 0x454   : >> { %v2285_v36 = vpop.f32.mrb[10].mxu1 }
 0x455   : >> { %v2289_v9 = vadd.f32 %v2285_v36, %v2143_v34  ;;  %v6350_v12 = vpop.f32.mrb[11].mxu1 }
 0x458   : >> { %v2442_v13 = vpop.f32.mrb[12].mxu1 }
 0x459   : >> { %v2446_v22 = vadd.f32 %v2442_v13, %v2289_v9  ;;  %v6362_v25 = vpop.f32.mrb[13].mxu1 }
 0x45c   : >> { %v2588_v14 = vpop.f32.mrb[14].mxu1 }
 0x45d   : >> { %v2592_v26 = vadd.f32 %v2588_v14, %v2446_v22  ;;  %v6374_v41 = vpop.f32.mrb[15].mxu1 }
 0x460   : >> { %v2734_v42 = vpop.f32.mrb[16].mxu1 }
 0x461   : >> { %v2738_v47 = vadd.f32 %v2734_v42, %v2592_v26  ;;  %v6386_v48 = vpop.f32.mrb[17].mxu1  ;;  %1381 = sbr.rel (!%p1379_p12) target bundleno = 437 (0x1b5), region = 173 }
 0x463   : >> { %v2745_v49 = vadd.f32 %v7459_v8, %v2738_v47  ;;  %v7629_v8 = vld [vmem:[%s8053_s5 + $0x68] sm:$0xff] (%p1379_p12) }
 0x465   : >> { %v2746_v50 = vmax.f32 %v2745_v49, 0.0 }
 0x467   : >> { %2750 = vst.msk [vmem:[%s2748_s21] sm:$0x7f] %vm2749_vm11, %v2746_v50 }
 0x468 LB: >> { %v6750_v62 = vpack.c.bf16 %v7569_v51, %v7564_v53  ;;  %v6753_v57 = vpack.c.bf16 %v7579_v54, %v7574_v52  ;;  %v7021_v63 = vmov 0.0|0.0   ;;  %s5929_s21 = sshll.u32 %s7014_s28, 4  ;;  %vm7022_vm12 = vmmov 0   ;;  %s5862_s25 = sshll.u32 %s7014_s28, 2  ;;  %s7014_s28 = sphi %s7656_s28, %s2783_s28  }
 0x469   : >> { %6749 = vmatprep.subr.bf16.mxu0 %v7021_v63  ;;  %6752 = vmatprep.subr.bf16.mxu1 %v7021_v63  ;;  %v7023_v0 = vmov 0.0   ;;  %s7670_s26 = scalar_lea.vmem [#allocation3], %s5929_s21  ;;  %vm2936_vm13 = vcmask 1046528   ;;  %vm2932_vm14 = vcmask 56320   ;;  %v6756_v46 = vpack.c.bf16 %v7589_v38, %v7584_v37  ;;  %s4120_s27 = scalar_lea.vmem [#allocation4], %s5862_s25 }
 0x46a   : >> { %6751 = vmatpush3.bf16.msra.mxu0 %v6750_v62  ;;  %6754 = vmatpush3.bf16.msra.mxu1 %v6753_v57  ;;  %v6759_v20 = vpack.c.bf16 %v7599_v40, %v7594_v39  ;;  %v6762_v44 = vpack.c.bf16 %v7609_v2, %v7604_v1  ;;  %v6765_v45 = vpack.c.bf16 %v7619_v6, %v7614_v3  ;;  %vm4121_vm15 = vcmask 256000   ;;  %s2783_s28 = sadd.s32 1, %s7014_s28  }
 0x46b   : >> { %6391 = vmatprep.mubr.msk.f32.mxu0 %vm7022_vm12, %v7023_v0  ;;  %6398 = vmatprep.mubr.msk.f32.mxu1 %vm7022_vm12, %v7023_v0  ;;  %v6768_v16 = vpack.c.bf16 %v7629_v8, %v7624_v7  ;;  %v6771_v21 = vpack.c.bf16 %v7639_v56, %v7634_v55  ;;  %v6774_v27 = vpack.c.bf16 %v7649_v60, %v7644_v59  ;;  %p2780_p13 = scmp.ge.s32.totalorder %s2783_s28, 3  }
 0x46c   : >> { %6401 = vmatprep.subr.mxu0 %v7023_v0  ;;  %6406 = vmatprep.subr.mxu1 %v7023_v0  ;;  %v4124_v53 = vld [vmem:[%s8055_s7 + $0x8] sm:$0xff] (%p2780_p13)  ;;  %v5865_v51 = vld [vmem:[%s8055_s7 + $0x30] sm:$0xff] (%p2780_p13)  ;;  %v5866_v52 = vld [vmem:[%s8055_s7 + $0x38] sm:$0xff] (%p2780_p13)  ;;  %vm7025_vm0 = vmmov (%p2780_p13), 0   ;;  %vm4169_vm1 = vcmask (%p2780_p13), 261120   ;;  %vm4317_vm2 = vcmask (%p2780_p13), 1042432  }
 0x46d   : > { %v4125_v37 = vld [vmem:[%s8055_s7 + $0x10] sm:$0xff] (%p2780_p13)  ;;  %v4126_v38 = vld [vmem:[%s8055_s7 + $0x18] sm:$0xff] (%p2780_p13)  ;;  %v6786_v39 = vpack.c.bf16 (%p2780_p13), %v5866_v52, %v5865_v51  ;;  %v5867_v2 = vld [vmem:[%s8055_s7 + $0x40] sm:$0xff] (%p2780_p13)  ;;  %vm4313_vm3 = vcmask (%p2780_p13), 23552   ;;  %vm5490_vm4 = vcmask (%p2780_p13), 253952   ;;  %s5923_s29 = sshll.u32 (%p2780_p13), %s7103_s17, 4 }
 0x46e   : >> { %v2787_v5 = vld [vmem:[%s7670_s26] sm:$0x7f]  ;;  %v5839_v43 = vld [vmem:[%s7670_s26 + $0x8] sm:$0x7f]  ;;  %v5851_v17 = vld [vmem:[%s7670_s26 + $0x10] sm:$0x7f]  ;;  %v6780_v40 = vpack.c.bf16 (%p2780_p13), %v4126_v38, %v4125_v37  ;;  %s8003_s28 = scalar_lea.hbm (%p2780_p13), %s8058_s10, %s5923_s29 }
 0x46f   : >> { %6392 = vmatmul.mubr.msk.f32.vlgmr.msra.gmra.mrb[0].mxu0 %vm1545_vm10, %v2787_v5  ;;  %6399 = vmatmul.mubr.msk.f32.vlgmr.msra.gmra.mrb[0].mxu1 %vm1545_vm10, %v2787_v5  ;;  %v5868_v3 = vld [vmem:[%s8055_s7 + $0x48] sm:$0xff] (%p2780_p13)  ;;  %v5869_v56 = vld [vmem:[%s8055_s7 + $0x50] sm:$0xff] (%p2780_p13)  ;;  %v5870_v59 = vld [vmem:[%s8055_s7 + $0x58] sm:$0xff] (%p2780_p13)  ;;  %s5584_s30 = sshll.u32 (%p2780_p13), %s7208_s11, 4  ;;  %s8062_s26 = sand.u32 (%p2780_p13), 1, %s6994_s14   ;;  %s8005_s30 = int_to_ptr.vmem [resolvable:$true] %s5584_s30 }
 0x470   : >> { %6403 = vmatprep.mubr.msk.f32.mxu0 %vm7022_vm12, %v7023_v0  ;;  %6408 = vmatprep.mubr.msk.f32.mxu1 %vm7022_vm12, %v7023_v0  ;;  %v6789_v7 = vpack.c.bf16 (%p2780_p13), %v5868_v3, %v5867_v2  ;;  %v5886_v37 = vld [vmem:[%s8055_s7 + $0xd8] sm:$0xff] (%p2780_p13)  ;;  %s5572_s25 = scalar_lea.sflag (%p2780_p13), [#allocation7], %s8062_s26  ;;  %s7026_s17 = smov (%p2780_p13), [#allocation6]  }
 0x471   : > { %s6932_s12 = sshll.u32 (%p2780_p13), %s7026_s17, 4  ;;  %s6933_s12 = int_to_ptr.vmem [resolvable:$false] %s6932_s12 }
 0x472   : > { %s6934_s18 = scalar_lea.vmem (%p2780_p13), %s6933_s12, 32  ;;  %p6935_p3 = scmp.lt.s32.totalorder (%p2780_p13), %s8005_s30, %s6933_s12 }
 0x542   : >> { %v2858_v10 = vpop.f32.mrb[0].mxu0  ;;  %v2928_v11 = vpop.f32.mrb[0].mxu1 }
 0x543   : >> { %v6400_v4 = vpop.f32.mrb[1].mxu1  ;;  %6402 = vmatpush3.msk.msra.mxu0 %vm2936_vm13, %v2928_v11  ;;  %6407 = vmatpush3.msk.msra.mxu1 %vm2936_vm13, %v2858_v10  ;;  %v6393_v15 = vpop.f32.mrb[1].mxu0 }
 0x544   : >> { %6404 = vmatmul.mubr.msk.f32.vlgmr.msra.gmra.mrb[2].mxu0 %vm2932_vm14, %v7195_v23  ;;  %6409 = vmatmul.mubr.msk.f32.vlgmr.msra.gmra.mrb[2].mxu1 %vm2932_vm14, %v7189_v19 }
 0x545   : >> { %6755 = vmatprep.subr.bf16.mxu0 %v7021_v63  ;;  %6415 = vmatprep.mubr.msk.f32.mxu0 %vm7022_vm12, %v7023_v0 }
 0x546   : >> { %6757 = vmatpush3.bf16.msra.mxu0 %v6756_v46  ;;  %6418 = vmatprep.subr.mxu1 %v7023_v0 }
 0x547   : >> { %6758 = vmatprep.subr.bf16.mxu0 %v7021_v63  ;;  %6420 = vmatprep.mubr.msk.f32.mxu1 %vm7022_vm12, %v7023_v0 }
 0x549   : >> { %6416 = vmatmul.mubr.msk.f32.vlgmr.msra.gmra.mrb[4].mxu0 %vm1545_vm10, %v2787_v5 }
 0x54a   : >> { %6760 = vmatpush3.bf16.msra.mxu0 %v6759_v20  ;;  %6427 = vmatprep.mubr.msk.f32.mxu0 %vm7022_vm12, %v7023_v0 }
 0x54b   : >> { %6761 = vmatprep.subr.bf16.mxu0 %v7021_v63 }
 0x54d   : >> { %6428 = vmatmul.mubr.msk.f32.vlgmr.msra.gmra.mrb[6].mxu0 %vm1545_vm10, %v5839_v43 }
 0x54e   : >> { %6763 = vmatpush3.bf16.msra.mxu0 %v6762_v44  ;;  %6439 = vmatprep.mubr.msk.f32.mxu0 %vm7022_vm12, %v7023_v0 }
 0x54f   : >> { %6764 = vmatprep.subr.bf16.mxu0 %v7021_v63 }
 0x551   : >> { %6440 = vmatmul.mubr.msk.f32.vlgmr.msra.gmra.mrb[8].mxu0 %vm1545_vm10, %v5839_v43 }
 0x552   : >> { %6766 = vmatpush3.bf16.msra.mxu0 %v6765_v45  ;;  %6451 = vmatprep.mubr.msk.f32.mxu0 %vm7022_vm12, %v7023_v0 }
 0x553   : >> { %6767 = vmatprep.subr.bf16.mxu0 %v7021_v63 }
 0x555   : >> { %6452 = vmatmul.mubr.msk.f32.vlgmr.msra.gmra.mrb[10].mxu0 %vm1545_vm10, %v5839_v43 }
 0x556   : >> { %6769 = vmatpush3.bf16.msra.mxu0 %v6768_v16  ;;  %6463 = vmatprep.mubr.msk.f32.mxu0 %vm7022_vm12, %v7023_v0 }
 0x557   : >> { %6770 = vmatprep.subr.bf16.mxu0 %v7021_v63 }
 0x559   : >> { %6464 = vmatmul.mubr.msk.f32.vlgmr.msra.gmra.mrb[12].mxu0 %vm1545_vm10, %v5851_v17 }
 0x55a   : >> { %6772 = vmatpush3.bf16.msra.mxu0 %v6771_v21  ;;  %6475 = vmatprep.mubr.msk.f32.mxu0 %vm7022_vm12, %v7023_v0 }
 0x55b   : >> { %6773 = vmatprep.subr.bf16.mxu0 %v7021_v63 }
 0x55d   : >> { %6476 = vmatmul.mubr.msk.f32.vlgmr.msra.gmra.mrb[14].mxu0 %vm1545_vm10, %v5851_v17 }
 0x55e   : >> { %6775 = vmatpush3.bf16.msra.mxu0 %v6774_v27  ;;  %6487 = vmatprep.mubr.msk.f32.mxu0 %vm7022_vm12, %v7023_v0 }
 0x561   : >> { %6488 = vmatmul.mubr.msk.f32.vlgmr.msra.gmra.mrb[16].mxu0 %vm1545_vm10, %v5851_v17 }
 0x562   : > { %6503 = vmatprep.mubr.msk.f32.mxu0 (%p2780_p13), %vm7025_vm0, %v7016_v18 }
 0x617   : >> { %v3006_v58 = vpop.f32.mrb[2].mxu0  ;;  %v3082_v28 = vpop.f32.mrb[2].mxu1 }
 0x618   : >> { %v3083_v29 = vadd.f32 %v3082_v28, %v3006_v58  ;;  %v6405_v30 = vpop.f32.mrb[3].mxu0  ;;  %v6410_v31 = vpop.f32.mrb[3].mxu1  ;;  %v5863_v28 = vld [vmem:[%s8055_s7 + $0x20] sm:$0xff] (%p2780_p13) }
 0x619   : > { %v4123_v30 = vld [vmem:[%s8055_s7] sm:$0xff] (%p2780_p13)  ;;  %v7024_v31 = vmov (%p2780_p13), 0.0|0.0  }
 0x61a   : > { %6776 = vmatprep.subr.bf16.mxu0 (%p2780_p13), %v7024_v31  ;;  %v6777_v54 = vpack.c.bf16 (%p2780_p13), %v4124_v53, %v4123_v30  ;;  %v5884_v53 = vld [vmem:[%s8055_s7 + $0xc8] sm:$0xff] (%p2780_p13) }
 0x61c   : >> { %v3152_v32 = vpop.f32.mrb[4].mxu0  ;;  %6778 = vmatpush3.bf16.msra.mxu0 (%p2780_p13), %v6777_v54  ;;  %v5885_v54 = vld [vmem:[%s8055_s7 + $0xd0] sm:$0xff] (%p2780_p13) }
 0x61d   : >> { %v6417_v33 = vpop.f32.mrb[5].mxu0  ;;  %6419 = vmatpush3.msk.msra.mxu1 %vm2936_vm13, %v3152_v32  ;;  %6779 = vmatprep.subr.bf16.mxu0 (%p2780_p13), %v7024_v31 }
 0x61e   : >> { %6421 = vmatmul.mubr.msk.f32.vlgmr.msra.gmra.mrb[4].mxu1 %vm2932_vm14, %v7198_v24  ;;  %6430 = vmatprep.subr.mxu1 %v7023_v0 }
 0x61f   : >> { %6432 = vmatprep.mubr.msk.f32.mxu1 %vm7022_vm12, %v7023_v0 }
 0x620   : >> { %v3306_v34 = vpop.f32.mrb[6].mxu0  ;;  %6781 = vmatpush3.bf16.msra.mxu0 (%p2780_p13), %v6780_v40 }
 0x621   : >> { %v6429_v35 = vpop.f32.mrb[7].mxu0  ;;  %6431 = vmatpush3.msk.msra.mxu1 %vm2936_vm13, %v3306_v34  ;;  %6517 = vmatprep.subr.mxu0 (%p2780_p13), %v7016_v18 }
 0x622   : >> { %6433 = vmatmul.mubr.msk.f32.vlgmr.msra.gmra.mrb[6].mxu1 %vm2932_vm14, %v7189_v19  ;;  %6442 = vmatprep.subr.mxu1 %v7023_v0 }
 0x623   : >> { %6444 = vmatprep.mubr.msk.f32.mxu1 %vm7022_vm12, %v7023_v0 }
 0x624   : >> { %v3450_v36 = vpop.f32.mrb[8].mxu0 }
 0x625   : >> { %v6441_v9 = vpop.f32.mrb[9].mxu0  ;;  %6443 = vmatpush3.msk.msra.mxu1 %vm2936_vm13, %v3450_v36 }
 0x626   : >> { %6445 = vmatmul.mubr.msk.f32.vlgmr.msra.gmra.mrb[8].mxu1 %vm2932_vm14, %v7195_v23  ;;  %6454 = vmatprep.subr.mxu1 %v7023_v0 }
 0x627   : >> { %6456 = vmatprep.mubr.msk.f32.mxu1 %vm7022_vm12, %v7023_v0 }
 0x628   : >> { %v3594_v12 = vpop.f32.mrb[10].mxu0 }
 0x629   : >> { %v6453_v13 = vpop.f32.mrb[11].mxu0  ;;  %6455 = vmatpush3.msk.msra.mxu1 %vm2936_vm13, %v3594_v12  ;;  %v5871_v12 = vld [vmem:[%s8055_s7 + $0x60] sm:$0xff] (%p2780_p13) }
 0x62a   : >> { %6457 = vmatmul.mubr.msk.f32.vlgmr.msra.gmra.mrb[10].mxu1 %vm2932_vm14, %v7198_v24  ;;  %6466 = vmatprep.subr.mxu1 %v7023_v0  ;;  %v5872_v13 = vld [vmem:[%s8055_s7 + $0x68] sm:$0xff] (%p2780_p13) }
 0x62b   : >> { %6468 = vmatprep.mubr.msk.f32.mxu1 %vm7022_vm12, %v7023_v0 }
 0x62c   : >> { %v3745_v22 = vpop.f32.mrb[12].mxu0 }
 0x62d   : >> { %v6465_v25 = vpop.f32.mrb[13].mxu0  ;;  %6467 = vmatpush3.msk.msra.mxu1 %vm2936_vm13, %v3745_v22  ;;  %v6795_v22 = vpack.c.bf16 (%p2780_p13), %v5872_v13, %v5871_v12  ;;  %v5893_v13 = vld [vmem:[%s8055_s7 + $0x110] sm:$0xff] (%p2780_p13) }
 0x62e   : >> { %6469 = vmatmul.mubr.msk.f32.vlgmr.msra.gmra.mrb[12].mxu1 %vm2932_vm14, %v7189_v19  ;;  %6478 = vmatprep.subr.mxu1 %v7023_v0 }
 0x62f   : >> { %6480 = vmatprep.mubr.msk.f32.mxu1 %vm7022_vm12, %v7023_v0 }
 0x630   : >> { %v3889_v14 = vpop.f32.mrb[14].mxu0 }
 0x631   : >> { %v6477_v26 = vpop.f32.mrb[15].mxu0  ;;  %6479 = vmatpush3.msk.msra.mxu1 %vm2936_vm13, %v3889_v14  ;;  %v5873_v14 = vld [vmem:[%s8055_s7 + $0x70] sm:$0xff] (%p2780_p13) }
 0x632   : >> { %6481 = vmatmul.mubr.msk.f32.vlgmr.msra.gmra.mrb[14].mxu1 %vm2932_vm14, %v7195_v23  ;;  %6490 = vmatprep.subr.mxu1 %v7023_v0  ;;  %v5874_v26 = vld [vmem:[%s8055_s7 + $0x78] sm:$0xff] (%p2780_p13) }
 0x633   : >> { %6492 = vmatprep.mubr.msk.f32.mxu1 %vm7022_vm12, %v7023_v0 }
 0x634   : >> { %v4033_v41 = vpop.f32.mrb[16].mxu0 }
 0x635   : >> { %v6489_v42 = vpop.f32.mrb[17].mxu0  ;;  %6491 = vmatpush3.msk.msra.mxu1 %vm2936_vm13, %v4033_v41 }
 0x636   : >> { %6493 = vmatmul.mubr.msk.f32.vlgmr.msra.gmra.mrb[16].mxu1 %vm2932_vm14, %v7198_v24  ;;  %6782 = vmatprep.subr.bf16.mxu1 (%p2780_p13), %v7024_v31  ;;  %v6798_v42 = vpack.c.bf16 (%p2780_p13), %v5874_v26, %v5873_v14 }
 0x637   : > { %6514 = vmatprep.mubr.msk.f32.mxu1 (%p2780_p13), %vm7025_vm0, %v7016_v18 }
 0x6f1   : >> { %v3228_v47 = vpop.f32.mrb[4].mxu1 }
 0x6f2   : >> { %v3232_v48 = vadd.f32 %v3228_v47, %v3083_v29  ;;  %v6422_v49 = vpop.f32.mrb[5].mxu1  ;;  %v5864_v29 = vld [vmem:[%s8055_s7 + $0x28] sm:$0xff] (%p2780_p13) }
 0x6f3   : > { %v6783_v32 = vpack.c.bf16 (%p2780_p13), %v5864_v29, %v5863_v28 }
 0x6f5   : >> { %v3379_v50 = vpop.f32.mrb[6].mxu1  ;;  %6784 = vmatpush3.bf16.msra.mxu1 (%p2780_p13), %v6783_v32  ;;  %v5883_v32 = vld [vmem:[%s8055_s7 + $0xc0] sm:$0xff] (%p2780_p13) }
 0x6f6   : >> { %v3383_v62 = vadd.f32 %v3379_v50, %v3232_v48  ;;  %v6434_v57 = vpop.f32.mrb[7].mxu1  ;;  %6785 = vmatprep.subr.bf16.mxu1 (%p2780_p13), %v7024_v31  ;;  %v6813_v51 = vpack.c.bf16 (%p2780_p13), %v5884_v53, %v5883_v32 }
 0x6f7   : > { %v5876_v57 = vld [vmem:[%s8055_s7 + $0x88] sm:$0xff] (%p2780_p13) }
 0x6f9   : >> { %v3523_v63 = vpop.f32.mrb[8].mxu1  ;;  %6787 = vmatpush3.bf16.msra.mxu1 (%p2780_p13), %v6786_v39  ;;  %v6816_v39 = vpack.c.bf16 (%p2780_p13), %v5886_v37, %v5885_v54 }
 0x6fa   : >> { %v3527_v5 = vadd.f32 %v3523_v63, %v3383_v62  ;;  %v6446_v10 = vpop.f32.mrb[9].mxu1  ;;  %6522 = vmatprep.subr.mxu1 (%p2780_p13), %v7016_v18  ;;  %v5875_v62 = vld [vmem:[%s8055_s7 + $0x80] sm:$0xff] (%p2780_p13) }
 0x6fb   : > { %v6801_v63 = vpack.c.bf16 (%p2780_p13), %v5876_v57, %v5875_v62  ;;  %v5877_v10 = vld [vmem:[%s8055_s7 + $0x90] sm:$0xff] (%p2780_p13)  ;;  %v4167_v57 = vld [vmem:[%s8056_s8] sm:$0x1] (%p2780_p13) }
 0x6fc   : > { %v5495_v62 = vld [vmem:[%s8057_s9 + $0x10] sm:$0xff] (%p2780_p13) }
 0x6fd   : >> { %v3667_v11 = vpop.f32.mrb[10].mxu1 }
 0x6fe   : >> { %v3671_v46 = vadd.f32 %v3667_v11, %v3527_v5  ;;  %v6458_v0 = vpop.f32.mrb[11].mxu1  ;;  %v5878_v11 = vld [vmem:[%s8055_s7 + $0x98] sm:$0xff] (%p2780_p13) }
 0x6ff   : > { %v6804_v0 = vpack.c.bf16 (%p2780_p13), %v5878_v11, %v5877_v10 }
 0x701   : >> { %v3818_v4 = vpop.f32.mrb[12].mxu1 }
 0x702   : >> { %v3822_v15 = vadd.f32 %v3818_v4, %v3671_v46  ;;  %v6470_v20 = vpop.f32.mrb[13].mxu1 }
 0x705   : >> { %v3962_v43 = vpop.f32.mrb[14].mxu1 }
 0x706   : >> { %v3966_v44 = vadd.f32 %v3962_v43, %v3822_v15  ;;  %v6482_v45 = vpop.f32.mrb[15].mxu1  ;;  %v5879_v43 = vld [vmem:[%s8055_s7 + $0xa0] sm:$0xff] (%p2780_p13) }
 0x709   : >> { %v4106_v16 = vpop.f32.mrb[16].mxu1 }
 0x70a   : >> { %v4110_v17 = vadd.f32 %v4106_v16, %v3966_v44  ;;  %v6494_v21 = vpop.f32.mrb[17].mxu1  ;;  %2782 = sbr.rel (!%p2780_p13) target bundleno = 1128 (0x468), region = 184  ;;  %v5880_v44 = vld [vmem:[%s8055_s7 + $0xa8] sm:$0xff] (%p2780_p13) }
 0x70b   : > { %v6807_v45 = vpack.c.bf16 (%p2780_p13), %v5880_v44, %v5879_v43  ;;  %v5882_v21 = vld [vmem:[%s8055_s7 + $0xb8] sm:$0xff] (%p2780_p13) }
 0x70c   : >> { %v4117_v27 = vadd.f32 %v7654_v61, %v4110_v17  ;;  %v6792_v61 = vpack.c.bf16 (%p2780_p13), %v5870_v59, %v5869_v56  ;;  %v5881_v17 = vld [vmem:[%s8055_s7 + $0xb0] sm:$0xff] (%p2780_p13)  ;;  %v5890_v59 = vld [vmem:[%s8055_s7 + $0xf8] sm:$0xff] (%p2780_p13) }
 0x70d   : > { %v5889_v56 = vld [vmem:[%s8055_s7 + $0xf0] sm:$0xff] (%p2780_p13) }
 0x70e   : >> { %v4118_v58 = vmax.f32 %v4117_v27, 0.0 }
 0x710   : >> { %4122 = vst.msk [vmem:[%s4120_s27] sm:$0x7] %vm4121_vm15, %v4118_v58  ;;  %v6810_v58 = vpack.c.bf16 (%p2780_p13), %v5882_v21, %v5881_v17  ;;  %s6928_s27 = scalar_lea.vmem (%p2780_p13), %s8005_s30, 16 }
 0x711   : > { %p6929_p0 = scmp.ne.s32.totalorder %s8005_s30, %s6928_s27  ;;  %p6936_p4 = scmp.lt.s32.totalorder %s6934_s18, %s6928_s27 }
 0x713   : > { %p6930_p1 = pnand %p6929_p0, %p7120_p5  ;;  %p6937_p7 = por %p6936_p4, %p6935_p3 }
 0x715   : > { %p6931_p2 = pneg %p6930_p1 }
 0x717   : > { %v4168_v1 = vld [vmem:[#allocation4] sm:$0x7]  ;;  %v4615_v47 = vld [vmem:[#allocation4 + $0x4] sm:$0x7]  ;;  %v5052_v40 = vld [vmem:[#allocation4 + $0x8] sm:$0x7]  ;;  %p6938_p8 = pnand %p6937_p7, %p6931_p2 }
 0x718   : > { %6515 = vmatmul.mubr.msk.f32.vlgmr.msra.gmra.mrb[0].mxu1 %vm4169_vm1, %v4168_v1  ;;  %6504 = vmatmul.mubr.msk.f32.vlgmr.msra.gmra.mrb[0].mxu0 %vm4169_vm1, %v4168_v1 }
 0x719   : > { %6524 = vmatprep.mubr.msk.f32.mxu1 %vm7025_vm0, %v7016_v18  ;;  %6519 = vmatprep.mubr.msk.f32.mxu0 %vm7025_vm0, %v7016_v18 }
 0x7eb   : > { %v4309_v6 = vpop.f32.mrb[0].mxu1  ;;  %v4239_v8 = vpop.f32.mrb[0].mxu0 }
 0x7ec   : > { %v6516_v55 = vpop.f32.mrb[1].mxu1  ;;  %6518 = vmatpush3.msk.msra.mxu0 %vm4317_vm2, %v4309_v6  ;;  %6523 = vmatpush3.msk.msra.mxu1 %vm4317_vm2, %v4239_v8  ;;  %v6505_v60 = vpop.f32.mrb[1].mxu0  ;;  %v5887_v6 = vld [vmem:[%s8055_s7 + $0xe0] sm:$0xff] }
 0x7ed   : > { %6520 = vmatmul.mubr.msk.f32.vlgmr.msra.gmra.mrb[2].mxu0 %vm4313_vm3, %v7195_v23  ;;  %6788 = vmatprep.subr.bf16.mxu0 %v7024_v31 }
 0x7ee   : > { %6525 = vmatmul.mubr.msk.f32.vlgmr.msra.gmra.mrb[2].mxu1 %vm4313_vm3, %v7189_v19  ;;  %6790 = vmatpush3.bf16.msra.mxu0 %v6789_v7  ;;  %v5888_v7 = vld [vmem:[%s8055_s7 + $0xe8] sm:$0xff] }
 0x7ef   : > { %6535 = vmatprep.mubr.msk.f32.mxu0 %vm7025_vm0, %v7016_v18  ;;  %6791 = vmatprep.subr.bf16.mxu0 %v7024_v31  ;;  %v6819_v8 = vpack.c.bf16 %v5888_v7, %v5887_v6 }
 0x7f0   : > { %6538 = vmatprep.subr.mxu1 %v7016_v18  ;;  %6540 = vmatprep.mubr.msk.f32.mxu1 %vm7025_vm0, %v7016_v18 }
 0x7f2   : > { %6793 = vmatpush3.bf16.msra.mxu0 %v6792_v61  ;;  %v6822_v61 = vpack.c.bf16 %v5890_v59, %v5889_v56 }
 0x7f3   : > { %6554 = vmatprep.subr.mxu0 %v7016_v18 }
 0x7f5   : > { %6536 = vmatmul.mubr.msk.f32.vlgmr.msra.gmra.mrb[4].mxu0 %vm4169_vm1, %v4168_v1 }
 0x7f6   : > { %6556 = vmatprep.mubr.msk.f32.mxu0 %vm7025_vm0, %v7016_v18 }
 0x8c0   : > { %v4387_v33 = vpop.f32.mrb[2].mxu0 }
 0x8c1   : > { %v6521_v34 = vpop.f32.mrb[3].mxu0  ;;  %v4463_v35 = vpop.f32.mrb[2].mxu1 }
 0x8c2   : > { %v4464_v36 = vadd.f32 %v4463_v35, %v4387_v33  ;;  %v6526_v9 = vpop.f32.mrb[3].mxu1  ;;  %v5891_v35 = vld [vmem:[%s8055_s7 + $0x100] sm:$0xff] }
 0x8c8   : > { %v4533_v25 = vpop.f32.mrb[4].mxu0 }
 0x8c9   : > { %v6537_v41 = vpop.f32.mrb[5].mxu0  ;;  %6539 = vmatpush3.msk.msra.mxu1 %vm4317_vm2, %v4533_v25 }
 0x8ca   : > { %6541 = vmatmul.mubr.msk.f32.vlgmr.msra.gmra.mrb[4].mxu1 %vm4313_vm3, %v7198_v24  ;;  %6794 = vmatprep.subr.bf16.mxu1 %v7024_v31 }
 0x8cb   : > { %6796 = vmatpush3.bf16.msra.mxu1 %v6795_v22  ;;  %6551 = vmatprep.mubr.msk.f32.mxu1 %vm7025_vm0, %v7016_v18  ;;  %v5894_v22 = vld [vmem:[%s8055_s7 + $0x118] sm:$0xff] }
 0x8cc   : > { %6797 = vmatprep.subr.bf16.mxu1 %v7024_v31  ;;  %v6828_v14 = vpack.c.bf16 %v5894_v22, %v5893_v13 }
 0x8cf   : > { %6799 = vmatpush3.bf16.msra.mxu1 %v6798_v42 }
 0x8d0   : > { %6570 = vmatprep.subr.mxu1 %v7016_v18 }
 0x8d2   : > { %6552 = vmatmul.mubr.msk.f32.vlgmr.msra.gmra.mrb[6].mxu1 %vm4169_vm1, %v4615_v47 }
 0x8d3   : > { %6572 = vmatprep.mubr.msk.f32.mxu1 %vm7025_vm0, %v7016_v18 }
 0x99d   : > { %v4609_v48 = vpop.f32.mrb[4].mxu1 }
 0x99e   : > { %v4613_v49 = vadd.f32 %v4609_v48, %v4464_v36  ;;  %v6542_v50 = vpop.f32.mrb[5].mxu1  ;;  %v5892_v36 = vld [vmem:[%s8055_s7 + $0x108] sm:$0xff] }
 0x99f   : > { %v6825_v9 = vpack.c.bf16 %v5892_v36, %v5891_v35 }
 0x9a5   : > { %v4685_v5 = vpop.f32.mrb[6].mxu1 }
 0x9a6   : > { %v6553_v46 = vpop.f32.mrb[7].mxu1  ;;  %6555 = vmatpush3.msk.msra.mxu0 %vm4317_vm2, %v4685_v5 }
 0x9a7   : > { %6557 = vmatmul.mubr.msk.f32.vlgmr.msra.gmra.mrb[6].mxu0 %vm4313_vm3, %v7189_v19  ;;  %6800 = vmatprep.subr.bf16.mxu0 %v7024_v31 }
 0x9a8   : > { %6802 = vmatpush3.bf16.msra.mxu0 %v6801_v63  ;;  %6567 = vmatprep.mubr.msk.f32.mxu0 %vm7025_vm0, %v7016_v18 }
 0x9a9   : > { %6803 = vmatprep.subr.bf16.mxu0 %v7024_v31 }
 0x9ac   : > { %6805 = vmatpush3.bf16.msra.mxu0 %v6804_v0 }
 0x9ad   : > { %6586 = vmatprep.subr.mxu0 %v7016_v18 }
 0x9af   : > { %6568 = vmatmul.mubr.msk.f32.vlgmr.msra.gmra.mrb[8].mxu0 %vm4169_vm1, %v4615_v47 }
 0x9b0   : > { %6588 = vmatprep.mubr.msk.f32.mxu0 %vm7025_vm0, %v7016_v18 }
 0xa7a   : > { %v4758_v4 = vpop.f32.mrb[6].mxu0 }
 0xa7b   : > { %v4762_v15 = vadd.f32 %v4758_v4, %v4613_v49  ;;  %v6558_v20 = vpop.f32.mrb[7].mxu0  ;;  %v5494_v49 = vld [vmem:[%s8057_s9 + $0x8] sm:$0xff] }
 0xa82   : > { %v4829_v16 = vpop.f32.mrb[8].mxu0 }
 0xa83   : > { %v6569_v27 = vpop.f32.mrb[9].mxu0  ;;  %6571 = vmatpush3.msk.msra.mxu1 %vm4317_vm2, %v4829_v16 }
 0xa84   : > { %6573 = vmatmul.mubr.msk.f32.vlgmr.msra.gmra.mrb[8].mxu1 %vm4313_vm3, %v7195_v23  ;;  %6806 = vmatprep.subr.bf16.mxu1 %v7024_v31 }
 0xa85   : > { %6808 = vmatpush3.bf16.msra.mxu1 %v6807_v45  ;;  %6583 = vmatprep.mubr.msk.f32.mxu1 %vm7025_vm0, %v7016_v18 }
 0xa86   : > { %6809 = vmatprep.subr.bf16.mxu1 %v7024_v31 }
 0xa89   : > { %6811 = vmatpush3.bf16.msra.mxu1 %v6810_v58 }
 0xa8a   : > { %6602 = vmatprep.subr.mxu1 %v7016_v18 }
 0xa8c   : > { %6584 = vmatmul.mubr.msk.f32.vlgmr.msra.gmra.mrb[10].mxu1 %vm4169_vm1, %v4615_v47 }
 0xa8d   : > { %6604 = vmatprep.mubr.msk.f32.mxu1 %vm7025_vm0, %v7016_v18 }
 0xb57   : > { %v4902_v28 = vpop.f32.mrb[8].mxu1 }
 0xb58   : > { %v4906_v29 = vadd.f32 %v4902_v28, %v4762_v15  ;;  %v6574_v30 = vpop.f32.mrb[9].mxu1 }
 0xb5f   : > { %v4973_v52 = vpop.f32.mrb[10].mxu1 }
 0xb60   : > { %v6585_v38 = vpop.f32.mrb[11].mxu1  ;;  %6587 = vmatpush3.msk.msra.mxu0 %vm4317_vm2, %v4973_v52 }
 0xb61   : > { %6589 = vmatmul.mubr.msk.f32.vlgmr.msra.gmra.mrb[10].mxu0 %vm4313_vm3, %v7198_v24  ;;  %6812 = vmatprep.subr.bf16.mxu0 %v7024_v31 }
 0xb62   : > { %6814 = vmatpush3.bf16.msra.mxu0 %v6813_v51  ;;  %6599 = vmatprep.mubr.msk.f32.mxu0 %vm7025_vm0, %v7016_v18 }
 0xb63   : > { %6815 = vmatprep.subr.bf16.mxu0 %v7024_v31 }
 0xb66   : > { %6817 = vmatpush3.bf16.msra.mxu0 %v6816_v39 }
 0xb67   : > { %6618 = vmatprep.subr.mxu0 %v7016_v18 }
 0xb69   : > { %6600 = vmatmul.mubr.msk.f32.vlgmr.msra.gmra.mrb[12].mxu0 %vm4169_vm1, %v5052_v40 }
 0xb6a   : > { %6620 = vmatprep.mubr.msk.f32.mxu0 %vm7025_vm0, %v7016_v18 }
 0xc34   : > { %v5046_v1 = vpop.f32.mrb[10].mxu0 }
 0xc35   : > { %v5050_v2 = vadd.f32 %v5046_v1, %v4906_v29  ;;  %v6590_v3 = vpop.f32.mrb[11].mxu0 }
 0xc3c   : > { %v5122_v55 = vpop.f32.mrb[12].mxu0 }
 0xc3d   : > { %v6601_v60 = vpop.f32.mrb[13].mxu0  ;;  %6603 = vmatpush3.msk.msra.mxu1 %vm4317_vm2, %v5122_v55 }
 0xc3e   : > { %6605 = vmatmul.mubr.msk.f32.vlgmr.msra.gmra.mrb[12].mxu1 %vm4313_vm3, %v7189_v19  ;;  %6818 = vmatprep.subr.bf16.mxu1 %v7024_v31 }
 0xc3f   : > { %6820 = vmatpush3.bf16.msra.mxu1 %v6819_v8  ;;  %6615 = vmatprep.mubr.msk.f32.mxu1 %vm7025_vm0, %v7016_v18 }
 0xc40   : > { %6821 = vmatprep.subr.bf16.mxu1 %v7024_v31 }
 0xc43   : > { %6823 = vmatpush3.bf16.msra.mxu1 %v6822_v61 }
 0xc44   : > { %6634 = vmatprep.subr.mxu1 %v7016_v18 }
 0xc46   : > { %6616 = vmatmul.mubr.msk.f32.vlgmr.msra.gmra.mrb[14].mxu1 %vm4169_vm1, %v5052_v40 }
 0xc47   : > { %6636 = vmatprep.mubr.msk.f32.mxu1 %vm7025_vm0, %v7016_v18 }
 0xd11   : > { %v5195_v33 = vpop.f32.mrb[12].mxu1 }
 0xd12   : > { %v5199_v34 = vadd.f32 %v5195_v33, %v5050_v2  ;;  %v6606_v19 = vpop.f32.mrb[13].mxu1 }
 0xd19   : > { %v5266_v12 = vpop.f32.mrb[14].mxu1 }
 0xd1a   : > { %v6617_v25 = vpop.f32.mrb[15].mxu1  ;;  %6619 = vmatpush3.msk.msra.mxu0 %vm4317_vm2, %v5266_v12 }
 0xd1b   : > { %6621 = vmatmul.mubr.msk.f32.vlgmr.msra.gmra.mrb[14].mxu0 %vm4313_vm3, %v7195_v23  ;;  %6824 = vmatprep.subr.bf16.mxu0 %v7024_v31  ;;  %v5493_v23 = vld [vmem:[%s8057_s9] sm:$0xff] }
 0xd1c   : > { %6826 = vmatpush3.bf16.msra.mxu0 %v6825_v9  ;;  %6631 = vmatprep.mubr.msk.f32.mxu0 %vm7025_vm0, %v7016_v18  ;;  %v6831_v50 = vpack.c.bf16 %v5494_v49, %v5493_v23 }
 0xd1d   : > { %6827 = vmatprep.subr.bf16.mxu0 %v7024_v31 }
 0xd20   : > { %6829 = vmatpush3.bf16.msra.mxu0 %v6828_v14 }
 0xd23   : > { %6632 = vmatmul.mubr.msk.f32.vlgmr.msra.gmra.mrb[16].mxu0 %vm4169_vm1, %v5052_v40 }
 0xdee   : > { %v5339_v26 = vpop.f32.mrb[14].mxu0 }
 0xdef   : > { %v5343_v41 = vadd.f32 %v5339_v26, %v5199_v34  ;;  %v6622_v42 = vpop.f32.mrb[15].mxu0 }
 0xdf6   : > { %v5410_v47 = vpop.f32.mrb[16].mxu0 }
 0xdf7   : > { %v6633_v48 = vpop.f32.mrb[17].mxu0  ;;  %6635 = vmatpush3.msk.msra.mxu1 %vm4317_vm2, %v5410_v47 }
 0xdf8   : > { %6637 = vmatmul.mubr.msk.f32.vlgmr.msra.gmra.mrb[16].mxu1 %vm4313_vm3, %v7198_v24  ;;  %6830 = vmatprep.subr.bf16.mxu1 %v7024_v31  ;;  %v5496_v24 = vld [vmem:[%s8057_s9 + $0x18] sm:$0xff] }
 0xdf9   : > { %6647 = vmatprep.mubr.msk.f32.mxu1 %vm7025_vm0, %v7016_v18  ;;  %6832 = vmatpush3.bf16.msra.mxu1 %v6831_v50  ;;  %v6834_v18 = vpack.c.bf16 %v5496_v24, %v5495_v62 }
 0xdfa   : > { %6833 = vmatprep.subr.bf16.mxu1 %v7024_v31 }
 0xdfd   : > { %6835 = vmatpush3.bf16.msra.mxu1 %v6834_v18 }
 0xecb   : > { %v5483_v63 = vpop.f32.mrb[16].mxu1 }
 0xecc   : > { %v5487_v5 = vadd.f32 %v5483_v63, %v5343_v41  ;;  %v6638_v10 = vpop.f32.mrb[17].mxu1 }
 0xece   : > { %v5488_v11 = vadd.f32 %v5487_v5, %v4167_v57 }
 0xed0   : > { %v5489_v46 = vmax.f32 %v5488_v11, 0.0 }
 0xed2   : > { %5491 = vst.msk [vmem:[#allocation5] sm:$0x1] %vm5490_vm4, %v5489_v46 }
 0xed9   : > { %v5492_v0 = vld [vmem:[#allocation5] sm:$0x1] }
 0xeda   : > { %6648 = vmatmul.mubr.msk.f32.vlgmr.msra.gmra.mrb[18].mxu1 %vm4169_vm1, %v5492_v0 }
 0xfad   : > { %v5566_v31 = vpop.f32.mrb[18].mxu1 }
 0xfae   : > { %5570 = vst [vmem:[%s7208_s11] sm:$0x1] %v5566_v31  ;;  %v6649_v4 = vpop.f32.mrb[19].mxu1 }
 0xfaf   : > { %6941 = shalt.err (!%p6938_p8)
}
 0xfb0   : > { %s6942_s11 = scalar_lea.hbm %s8003_s28, 16  ;;  %s6946_s21 = scalar_lea.hbm %s8058_s10, 32 }
 0xfb1   : > { %p6943_p9 = scmp.ne.s32.totalorder %s8003_s28, %s6942_s11  ;;  %p6947_p12 = scmp.lt.u32.totalorder %s8003_s28, %s8058_s10 }
 0xfb2   : > { %p6948_p13 = scmp.lt.u32.totalorder %s6946_s21, %s6942_s11  ;;  %p6950_p1 = scmp.lt.u32.totalorder %s6942_s11, %s8003_s28 }
 0xfb3   : > { %p6944_p10 = pnand %p6943_p9, %p7120_p5 }
 0xfb4   : > { %p6949_p0 = por %p6948_p13, %p6947_p12 }
 0xfb5   : > { %p6945_p11 = pneg %p6944_p10 }
 0xfb6   : > { %p6951_p2 = por %p6950_p1, %p6949_p0 }
 0xfb8   : > { %p6952_p3 = pnand %p6951_p2, %p6945_p11 }
 0xfba   : > { %6955 = shalt.err (!%p6952_p3)
}
 0xfbb   : > { %6853 = dma.vmem_to_hbm [thread:$0]  (%p7120_p5), %s8005_s30, 16, %s8003_s28, %s5572_s25  }
 0xfbc PF: > { %p6859_p4 = scmp.ge.s32.totalorder %s7002_s16, 2  ;;  %s5596_s27 = sand.u32 1, %s6990_s13  }
 0xfbd   : > { %s5597_s12 = scalar_lea.sflag [#allocation7], %s5596_s27 }
 0xfbe   : > { %p6856_p7 = pnand %p6859_p4, %p7124_p6 }
 0xfc0   : > { %6985 = dma.done.wait (!%p6856_p7), %s5597_s12, 16  }
 0xfc1   : > { %6987 = vsyncadd (!%p6856_p7), %s5597_s12, 4294967280  ;;  %p20_p8 = scmp.ge.s32.totalorder %s7107_s19, 4   ;;  %s8063_s13 = smov %s6994_s14 }
 0xfc2   : > { %s8064_s14 = smov %s6998_s15  ;;  %s8065_s15 = smov %s7118_s22 }
 0xfc3   : > { %s8066_s16 = smov %s7107_s19  ;;  %22 = sbr.rel (!%p20_p8) target bundleno = 3 (0x3), region = 195 }
 0xfca   :  { %5601 = vsyncpa [#allocation7], 1 }
 0xfcb   :  { %5603 = vsyncpa [#allocation7 + $0x1], 1 }

</bundles_post_ra>
